<compile_context>
chip_gen: v7x
topology: tpu7x:2x2x1
jax: 0.10.0
libtpu: 0.0.40
codegen_flags: <defaults>
</compile_context>

<pallas_src>
import functools
import math

import jax
import jax.numpy as jnp
from jax import lax
from jax.experimental import pallas as pl
from jax.experimental.pallas import tpu as pltpu


def _fused_mha_kernel(q_ref, k_ref, v_ref,
                      wq_ref, bq_ref, wk_ref, bk_ref, wv_ref, bv_ref,
                      wo_ref, bo_ref, o_ref,
                      k_scratch, v_scratch,
                      *, num_heads, head_dim):
    """One (batch, query-tile) grid step of fused multi-head cross-attention.

    grid = (B, Sq // TQ); the query-tile axis is the inner (fastest) axis, so
    the K/V projections are computed once per batch element (tile 0) into VMEM
    scratch and reused by all query tiles of that batch element.
    """
    # ---- K/V projections: only on the first query tile of this batch element.
    @pl.when(pl.program_id(1) == 0)
    def _project_kv():
        k = k_ref[0]                                           # (Sk, E) bf16
        v = v_ref[0]                                           # (Sk, E) bf16
        K = jnp.dot(k, wk_ref[...], preferred_element_type=jnp.float32) + bk_ref[...]
        V = jnp.dot(v, wv_ref[...], preferred_element_type=jnp.float32) + bv_ref[...]
        k_scratch[...] = K.astype(k_scratch.dtype)             # resident (Sk, E) bf16
        v_scratch[...] = V.astype(v_scratch.dtype)

    # ---- Q projection for this query tile (bf16 operands, f32 accumulation).
    q = q_ref[0]                                               # (TQ, E) bf16
    Q = jnp.dot(q, wq_ref[...], preferred_element_type=jnp.float32) + bq_ref[...]
    # Module scales by 1/sqrt(model_dim) where model_dim = embed_dim//num_heads
    # == head_dim; fold the scale into Q (E-wide multiply, not Sk-wide).
    Q = Q * jnp.float32(1.0 / math.sqrt(head_dim))
    Qb = Q.astype(jnp.bfloat16)

    K = k_scratch[...]                                         # (Sk, E) bf16
    V = v_scratch[...]                                         # (Sk, E) bf16
    wo = wo_ref[...]                                           # (E, E)  bf16

    tq = Qb.shape[0]
    embed = wo.shape[1]

    # Accumulator starts at the output-projection bias (WO fused via linearity).
    acc = jnp.broadcast_to(bo_ref[...].astype(jnp.float32), (tq, embed))

    # Short static unrolled loop over heads (num_heads is a compile-time const).
    for h in range(num_heads):
        lo = h * head_dim
        hi = lo + head_dim
        q_h = Qb[:, lo:hi]                                     # (TQ, D) bf16
        k_h = K[:, lo:hi]                                      # (Sk, D) bf16
        v_h = V[:, lo:hi]                                      # (Sk, D) bf16

        # scores = Q_h @ K_h^T, contracting last dims (no materialized transpose).
        s = lax.dot_general(q_h, k_h, (((1,), (1,)), ((), ())),
                            preferred_element_type=jnp.float32)  # (TQ, Sk) f32
        # Softmax in f32; denominator reciprocal goes to the EUP.
        s = s - jnp.max(s, axis=-1, keepdims=True)
        p = jnp.exp(s)
        r = pl.reciprocal(jnp.sum(p, axis=-1, keepdims=True), approx=True)
        # TODO(synk): for long Sk, tile Sk here with an online-softmax running
        # max/sum (flash-style) instead of materializing the full (TQ, Sk) block.
        ctx = jnp.dot(p.astype(jnp.bfloat16), v_h,
                      preferred_element_type=jnp.float32) * r    # (TQ, D) f32

        # concat(heads) @ WO == sum_h head_h @ WO[h*D:(h+1)*D, :]
        acc = acc + jnp.dot(ctx.astype(jnp.bfloat16), wo[lo:hi, :],
                            preferred_element_type=jnp.float32)

    o_ref[0] = acc.astype(o_ref.dtype)                          # lane-dense (TQ, E) store


def fuse_params(params, compute_dtype=jnp.bfloat16):
    """One-time fusion of per-head weights into lane-dense fused matrices.

    Called once up front (NOT per forward pass) so the transpose/reshape of the
    weight stack is not re-executed / re-DMA'd on every call. Weights are cast
    to bf16 (MXU operands); biases stay f32 (added after f32 accumulation).
    """
    H, E, D = params["wq"].shape

    def fuse_w(w):   # (H, E, D) -> (E, H*D); columns h*D:(h+1)*D == head h
        return jnp.transpose(w, (1, 0, 2)).reshape(E, H * D).astype(compute_dtype)

    def fuse_b(b):   # (H, 1, D) -> (1, H*D)
        return b.reshape(1, H * D).astype(jnp.float32)

    return {
        "wq": fuse_w(params["wq"]), "bq": fuse_b(params["bq"]),
        "wk": fuse_w(params["wk"]), "bk": fuse_b(params["bk"]),
        "wv": fuse_w(params["wv"]), "bv": fuse_b(params["bv"]),
        "wo": params["wo"].astype(compute_dtype),
        "bo": params["bo"].astype(jnp.float32),
    }


def _pick_query_tile(sq):
    """Largest query tile <= 256 that divides Sq (256 fills the v6e/v7x MXU)."""
    if sq <= 256:
        return sq
    for t in (256, 128, 64, 32, 16, 8):
        if sq % t == 0:
            return t
    return sq


@functools.partial(jax.jit, static_argnames=("num_heads", "tq"))
def multihead_cross_attention(q, k, v, fused, *, num_heads, tq=None):
    B, Sq, E = q.shape
    Sk = k.shape[1]
    D = E // num_heads
    if tq is None:
        tq = _pick_query_tile(Sq)

    kernel = functools.partial(_fused_mha_kernel, num_heads=num_heads, head_dim=D)

    out = pl.pallas_call(
        kernel,
        out_shape=jax.ShapeDtypeStruct((B, Sq, E), jnp.float32),
        grid_spec=pltpu.PrefetchScalarGridSpec(
            num_scalar_prefetch=0,
            grid=(B, Sq // tq),                                  # Sq tiles are the inner axis
            in_specs=[
                pl.BlockSpec((1, tq, E), lambda b, i: (b, i, 0)),   # q tile
                pl.BlockSpec((1, Sk, E), lambda b, i: (b, 0, 0)),   # k (constant in i)
                pl.BlockSpec((1, Sk, E), lambda b, i: (b, 0, 0)),   # v (constant in i)
                pl.BlockSpec((E, E), lambda b, i: (0, 0)),          # Wq (heads fused), resident
                pl.BlockSpec((1, E), lambda b, i: (0, 0)),          # bq
                pl.BlockSpec((E, E), lambda b, i: (0, 0)),          # Wk
                pl.BlockSpec((1, E), lambda b, i: (0, 0)),          # bk
                pl.BlockSpec((E, E), lambda b, i: (0, 0)),          # Wv
                pl.BlockSpec((1, E), lambda b, i: (0, 0)),          # bv
                pl.BlockSpec((E, E), lambda b, i: (0, 0)),          # WO
                pl.BlockSpec((1, E), lambda b, i: (0, 0)),          # bO
            ],
            out_specs=pl.BlockSpec((1, tq, E), lambda b, i: (b, i, 0)),
            scratch_shapes=[
                pltpu.VMEM((Sk, E), jnp.bfloat16),   # projected K, persists across query tiles
                pltpu.VMEM((Sk, E), jnp.bfloat16),   # projected V, persists across query tiles
            ],
        ),
        compiler_params=pltpu.CompilerParams(
            # Batch axis parallel (megacore shards it); query-tile axis carries
            # the K/V scratch so it must stay "arbitrary".
            dimension_semantics=("parallel", "arbitrary"),
            vmem_limit_bytes=64 * 1024 * 1024,
        ),
    )(q.astype(jnp.bfloat16), k.astype(jnp.bfloat16), v.astype(jnp.bfloat16),
      fused["wq"], fused["bq"], fused["wk"], fused["bk"],
      fused["wv"], fused["bv"], fused["wo"], fused["bo"])

    return out


def _reference(q, k, v, params):
    """Pure-JAX f32 reference mirroring the PyTorch forward exactly."""
    H, _, D = params["wq"].shape
    heads = []
    for h in range(H):
        Q = q @ params["wq"][h] + params["bq"][h, 0]
        K = k @ params["wk"][h] + params["bk"][h, 0]
        V = v @ params["wv"][h] + params["bv"][h, 0]
        s = (Q @ jnp.swapaxes(K, -2, -1)) / jnp.float32(D ** 0.5)
        p = jax.nn.softmax(s, axis=-1)
        heads.append(p @ V)
    cat = jnp.concatenate(heads, axis=-1)
    return cat @ params["wo"] + params["bo"][0]


def init_params(key, embed_dim, num_heads):
    D = embed_dim // num_heads
    ks = jax.random.split(key, 8)
    scale = 0.1
    return {
        "wq": scale * jax.random.normal(ks[0], (num_heads, embed_dim, D), jnp.float32),
        "bq": scale * jax.random.normal(ks[1], (num_heads, 1, D), jnp.float32),
        "wk": scale * jax.random.normal(ks[2], (num_heads, embed_dim, D), jnp.float32),
        "bk": scale * jax.random.normal(ks[3], (num_heads, 1, D), jnp.float32),
        "wv": scale * jax.random.normal(ks[4], (num_heads, embed_dim, D), jnp.float32),
        "bv": scale * jax.random.normal(ks[5], (num_heads, 1, D), jnp.float32),
        "wo": scale * jax.random.normal(ks[6], (embed_dim, embed_dim), jnp.float32),
        "bo": scale * jax.random.normal(ks[7], (1, embed_dim), jnp.float32),
    }


if __name__ == "__main__":
    B, Sq, Sk = 2, 8, 16       # batch, query seq len, key/value seq len
    E, H = 32, 4               # embed_dim, num_heads  (model_dim D = 8)

    key = jax.random.PRNGKey(0)
    kq, kk, kv, kp = jax.random.split(key, 4)
    q = jax.random.normal(kq, (B, Sq, E), jnp.float32)
    k = jax.random.normal(kk, (B, Sk, E), jnp.float32)
    v = jax.random.normal(kv, (B, Sk, E), jnp.float32)
    params = init_params(kp, E, H)

    fused = fuse_params(params)                     # one-time weight fusion (not per call)
    out = multihead_cross_attention(q, k, v, fused, num_heads=H)
    out = jax.block_until_ready(out)

    ref = _reference(q, k, v, params)
    assert out.shape == (B, Sq, E)
    # bf16 MXU operands + approx reciprocal -> bf16-level tolerance vs f32 reference.
    assert jnp.allclose(out, ref, atol=2e-2, rtol=2e-2), "mismatch vs reference"

    print("KERNEL_OK")
</pallas_src>

<mosaic_0001>
module attributes {stable_mosaic.version = 11 : i64} {
  func.func @_fused_mha_kernel(%arg0: i32, %arg1: i32, %arg2: memref<1x8x32xbf16, #tpu.memory_space<vmem>>, %arg3: memref<1x16x32xbf16, #tpu.memory_space<vmem>>, %arg4: memref<1x16x32xbf16, #tpu.memory_space<vmem>>, %arg5: memref<32x32xbf16, #tpu.memory_space<vmem>>, %arg6: memref<1x32xf32, #tpu.memory_space<vmem>>, %arg7: memref<32x32xbf16, #tpu.memory_space<vmem>>, %arg8: memref<1x32xf32, #tpu.memory_space<vmem>>, %arg9: memref<32x32xbf16, #tpu.memory_space<vmem>>, %arg10: memref<1x32xf32, #tpu.memory_space<vmem>>, %arg11: memref<32x32xbf16, #tpu.memory_space<vmem>>, %arg12: memref<1x32xf32, #tpu.memory_space<vmem>>, %arg13: memref<1x8x32xf32, #tpu.memory_space<vmem>>, %arg14: memref<16x32xbf16, #tpu.memory_space<vmem>>, %arg15: memref<16x32xbf16, #tpu.memory_space<vmem>>) attributes {dimension_semantics = [#tpu.dimension_semantics<parallel>, #tpu.dimension_semantics<arbitrary>], iteration_bounds = array<i64: 2, 1>, scalar_prefetch = 0 : i64, scratch_operands = 2 : i64, tpu.core_type = #tpu.core_type<tc>, window_params = [{transform_indices = @transform_0, window_bounds = array<i64: 1, 8, 32>}, {transform_indices = @transform_1, window_bounds = array<i64: 1, 16, 32>}, {transform_indices = @transform_2, window_bounds = array<i64: 1, 16, 32>}, {pipeline_mode = #tpu.pipeline_mode<synchronous>, transform_indices = @transform_3, window_bounds = array<i64: 32, 32>}, {pipeline_mode = #tpu.pipeline_mode<synchronous>, transform_indices = @transform_4, window_bounds = array<i64: 1, 32>}, {pipeline_mode = #tpu.pipeline_mode<synchronous>, transform_indices = @transform_5, window_bounds = array<i64: 32, 32>}, {pipeline_mode = #tpu.pipeline_mode<synchronous>, transform_indices = @transform_6, window_bounds = array<i64: 1, 32>}, {pipeline_mode = #tpu.pipeline_mode<synchronous>, transform_indices = @transform_7, window_bounds = array<i64: 32, 32>}, {pipeline_mode = #tpu.pipeline_mode<synchronous>, transform_indices = @transform_8, window_bounds = array<i64: 1, 32>}, {pipeline_mode = #tpu.pipeline_mode<synchronous>, transform_indices = @transform_9, window_bounds = array<i64: 32, 32>}, {pipeline_mode = #tpu.pipeline_mode<synchronous>, transform_indices = @transform_10, window_bounds = array<i64: 1, 32>}, {transform_indices = @transform_11, window_bounds = array<i64: 1, 8, 32>}]} {
    %c0_i32 = arith.constant 0 : i32
    %0 = arith.cmpi eq, %arg1, %c0_i32 : i32
    %1 = arith.extui %0 : i1 to i32
    %c0_i32_0 = arith.constant 0 : i32
    %2 = arith.cmpi ne, %1, %c0_i32_0 : i32
    scf.if %2 {
      %c0_39 = arith.constant 0 : index
      %c0_40 = arith.constant 0 : index
      %c0_41 = arith.constant 0 : index
      %102 = vector.load %arg3[%c0_39, %c0_40, %c0_41] : memref<1x16x32xbf16, #tpu.memory_space<vmem>>, vector<1x16x32xbf16>
      %103 = vector.shape_cast %102 : vector<1x16x32xbf16> to vector<16x32xbf16>
      %c0_42 = arith.constant 0 : index
      %c0_43 = arith.constant 0 : index
      %c0_44 = arith.constant 0 : index
      %104 = vector.load %arg4[%c0_42, %c0_43, %c0_44] : memref<1x16x32xbf16, #tpu.memory_space<vmem>>, vector<1x16x32xbf16>
      %105 = vector.shape_cast %104 : vector<1x16x32xbf16> to vector<16x32xbf16>
      %c0_45 = arith.constant 0 : index
      %c0_46 = arith.constant 0 : index
      %106 = vector.load %arg7[%c0_45, %c0_46] : memref<32x32xbf16, #tpu.memory_space<vmem>>, vector<32x32xbf16>
      %cst_47 = arith.constant dense<0.000000e+00> : vector<16x32xf32>
      %107 = tpu.matmul %103, %106, %cst_47 {dimension_numbers = #tpu.dot_dimension_numbers<[1], [0], [0], [1], [0, 0, 1, 1], [], []>} : vector<16x32xbf16>, vector<32x32xbf16>, vector<16x32xf32> -> vector<16x32xf32>
      %c0_48 = arith.constant 0 : index
      %c0_49 = arith.constant 0 : index
      %108 = vector.load %arg8[%c0_48, %c0_49] : memref<1x32xf32, #tpu.memory_space<vmem>>, vector<1x32xf32>
      %109 = vector.broadcast %108 : vector<1x32xf32> to vector<16x32xf32>
      %110 = arith.addf %107, %109 : vector<16x32xf32>
      %c0_50 = arith.constant 0 : index
      %c0_51 = arith.constant 0 : index
      %111 = vector.load %arg9[%c0_50, %c0_51] : memref<32x32xbf16, #tpu.memory_space<vmem>>, vector<32x32xbf16>
      %cst_52 = arith.constant dense<0.000000e+00> : vector<16x32xf32>
      %112 = tpu.matmul %105, %111, %cst_52 {dimension_numbers = #tpu.dot_dimension_numbers<[1], [0], [0], [1], [0, 0, 1, 1], [], []>} : vector<16x32xbf16>, vector<32x32xbf16>, vector<16x32xf32> -> vector<16x32xf32>
      %c0_53 = arith.constant 0 : index
      %c0_54 = arith.constant 0 : index
      %113 = vector.load %arg10[%c0_53, %c0_54] : memref<1x32xf32, #tpu.memory_space<vmem>>, vector<1x32xf32>
      %114 = vector.broadcast %113 : vector<1x32xf32> to vector<16x32xf32>
      %115 = arith.addf %112, %114 : vector<16x32xf32>
      %116 = arith.truncf %110 : vector<16x32xf32> to vector<16x32xbf16>
      %c0_55 = arith.constant 0 : index
      %c0_56 = arith.constant 0 : index
      %117 = vector.load %arg14[%c0_55, %c0_56] : memref<16x32xbf16, #tpu.memory_space<vmem>>, vector<16x32xbf16>
      tpu.vector_store %arg14[%c0_55, %c0_56], %116 {strides = array<i32>} : memref<16x32xbf16, #tpu.memory_space<vmem>>, vector<16x32xbf16>,
      %118 = arith.truncf %115 : vector<16x32xf32> to vector<16x32xbf16>
      %c0_57 = arith.constant 0 : index
      %c0_58 = arith.constant 0 : index
      %119 = vector.load %arg15[%c0_57, %c0_58] : memref<16x32xbf16, #tpu.memory_space<vmem>>, vector<16x32xbf16>
      tpu.vector_store %arg15[%c0_57, %c0_58], %118 {strides = array<i32>} : memref<16x32xbf16, #tpu.memory_space<vmem>>, vector<16x32xbf16>,
    } else {
    }
    %c0 = arith.constant 0 : index
    %c0_1 = arith.constant 0 : index
    %c0_2 = arith.constant 0 : index
    %3 = vector.load %arg2[%c0, %c0_1, %c0_2] : memref<1x8x32xbf16, #tpu.memory_space<vmem>>, vector<1x8x32xbf16>
    %4 = vector.shape_cast %3 : vector<1x8x32xbf16> to vector<8x32xbf16>
    %c0_3 = arith.constant 0 : index
    %c0_4 = arith.constant 0 : index
    %5 = vector.load %arg5[%c0_3, %c0_4] : memref<32x32xbf16, #tpu.memory_space<vmem>>, vector<32x32xbf16>
    %cst = arith.constant dense<0.000000e+00> : vector<8x32xf32>
    %6 = tpu.matmul %4, %5, %cst {dimension_numbers = #tpu.dot_dimension_numbers<[1], [0], [0], [1], [0, 0, 1, 1], [], []>} : vector<8x32xbf16>, vector<32x32xbf16>, vector<8x32xf32> -> vector<8x32xf32>
    %c0_5 = arith.constant 0 : index
    %c0_6 = arith.constant 0 : index
    %7 = vector.load %arg6[%c0_5, %c0_6] : memref<1x32xf32, #tpu.memory_space<vmem>>, vector<1x32xf32>
    %8 = vector.broadcast %7 : vector<1x32xf32> to vector<8x32xf32>
    %9 = arith.addf %6, %8 : vector<8x32xf32>
    %cst_7 = arith.constant 0.353553385 : f32
    %10 = vector.broadcast %cst_7 : f32 to vector<8x32xf32>
    %11 = arith.mulf %9, %10 : vector<8x32xf32>
    %12 = arith.truncf %11 : vector<8x32xf32> to vector<8x32xbf16>
    %c0_8 = arith.constant 0 : index
    %c0_9 = arith.constant 0 : index
    %13 = vector.load %arg14[%c0_8, %c0_9] : memref<16x32xbf16, #tpu.memory_space<vmem>>, vector<16x32xbf16>
    %c0_10 = arith.constant 0 : index
    %c0_11 = arith.constant 0 : index
    %14 = vector.load %arg15[%c0_10, %c0_11] : memref<16x32xbf16, #tpu.memory_space<vmem>>, vector<16x32xbf16>
    %c0_12 = arith.constant 0 : index
    %c0_13 = arith.constant 0 : index
    %15 = vector.load %arg11[%c0_12, %c0_13] : memref<32x32xbf16, #tpu.memory_space<vmem>>, vector<32x32xbf16>
    %c0_14 = arith.constant 0 : index
    %c0_15 = arith.constant 0 : index
    %16 = vector.load %arg12[%c0_14, %c0_15] : memref<1x32xf32, #tpu.memory_space<vmem>>, vector<1x32xf32>
    %17 = vector.shape_cast %16 : vector<1x32xf32> to vector<1x32xf32>
    %18 = vector.broadcast %17 : vector<1x32xf32> to vector<8x32xf32>
    %19 = vector.extract_strided_slice %12 {offsets = [0, 0], sizes = [8, 8], strides = [1, 1]} : vector<8x32xbf16> to vector<8x8xbf16>
    %20 = vector.extract_strided_slice %13 {offsets = [0, 0], sizes = [16, 8], strides = [1, 1]} : vector<16x32xbf16> to vector<16x8xbf16>
    %21 = vector.extract_strided_slice %14 {offsets = [0, 0], sizes = [16, 8], strides = [1, 1]} : vector<16x32xbf16> to vector<16x8xbf16>
    %cst_16 = arith.constant dense<0.000000e+00> : vector<8x16xf32>
    %22 = tpu.matmul %19, %20, %cst_16 {dimension_numbers = #tpu.dot_dimension_numbers<[1], [1], [0], [0], [0, 0, 1, 0], [], []>} : vector<8x8xbf16>, vector<16x8xbf16>, vector<8x16xf32> -> vector<8x16xf32>
    %cst_17 = arith.constant dense<0xFF800000> : vector<8xf32>
    %23 = vector.multi_reduction <maximumf>, %22, %cst_17 [1] : vector<8x16xf32> to vector<8xf32>
    %24 = vector.shape_cast %23 : vector<8xf32> to vector<8x1xf32>
    %25 = vector.broadcast %24 : vector<8x1xf32> to vector<8x16xf32>
    %26 = arith.subf %22, %25 : vector<8x16xf32>
    %27 = math.exp %26 : vector<8x16xf32>
    %cst_18 = arith.constant dense<0.000000e+00> : vector<8xf32>
    %28 = vector.multi_reduction <add>, %27, %cst_18 [1] : vector<8x16xf32> to vector<8xf32>
    %29 = vector.shape_cast %28 : vector<8xf32> to vector<8x1xf32>
    %30 = tpu.reciprocal %29 {approx = true} : vector<8x1xf32> -> vector<8x1xf32>
    %31 = arith.truncf %27 : vector<8x16xf32> to vector<8x16xbf16>
    %cst_19 = arith.constant dense<0.000000e+00> : vector<8x8xf32>
    %32 = tpu.matmul %31, %21, %cst_19 {dimension_numbers = #tpu.dot_dimension_numbers<[1], [0], [0], [1], [0, 0, 1, 1], [], []>} : vector<8x16xbf16>, vector<16x8xbf16>, vector<8x8xf32> -> vector<8x8xf32>
    %33 = vector.broadcast %30 : vector<8x1xf32> to vector<8x8xf32>
    %34 = arith.mulf %32, %33 : vector<8x8xf32>
    %35 = arith.truncf %34 : vector<8x8xf32> to vector<8x8xbf16>
    %36 = vector.extract_strided_slice %15 {offsets = [0, 0], sizes = [8, 32], strides = [1, 1]} : vector<32x32xbf16> to vector<8x32xbf16>
    %cst_20 = arith.constant dense<0.000000e+00> : vector<8x32xf32>
    %37 = tpu.matmul %35, %36, %cst_20 {dimension_numbers = #tpu.dot_dimension_numbers<[1], [0], [0], [1], [0, 0, 1, 1], [], []>} : vector<8x8xbf16>, vector<8x32xbf16>, vector<8x32xf32> -> vector<8x32xf32>
    %38 = arith.addf %18, %37 : vector<8x32xf32>
    %39 = vector.extract_strided_slice %12 {offsets = [0, 8], sizes = [8, 8], strides = [1, 1]} : vector<8x32xbf16> to vector<8x8xbf16>
    %40 = vector.extract_strided_slice %13 {offsets = [0, 8], sizes = [16, 8], strides = [1, 1]} : vector<16x32xbf16> to vector<16x8xbf16>
    %41 = vector.extract_strided_slice %14 {offsets = [0, 8], sizes = [16, 8], strides = [1, 1]} : vector<16x32xbf16> to vector<16x8xbf16>
    %cst_21 = arith.constant dense<0.000000e+00> : vector<8x16xf32>
    %42 = tpu.matmul %39, %40, %cst_21 {dimension_numbers = #tpu.dot_dimension_numbers<[1], [1], [0], [0], [0, 0, 1, 0], [], []>} : vector<8x8xbf16>, vector<16x8xbf16>, vector<8x16xf32> -> vector<8x16xf32>
    %cst_22 = arith.constant dense<0xFF800000> : vector<8xf32>
    %43 = vector.multi_reduction <maximumf>, %42, %cst_22 [1] : vector<8x16xf32> to vector<8xf32>
    %44 = vector.shape_cast %43 : vector<8xf32> to vector<8x1xf32>
    %45 = vector.broadcast %44 : vector<8x1xf32> to vector<8x16xf32>
    %46 = arith.subf %42, %45 : vector<8x16xf32>
    %47 = math.exp %46 : vector<8x16xf32>
    %cst_23 = arith.constant dense<0.000000e+00> : vector<8xf32>
    %48 = vector.multi_reduction <add>, %47, %cst_23 [1] : vector<8x16xf32> to vector<8xf32>
    %49 = vector.shape_cast %48 : vector<8xf32> to vector<8x1xf32>
    %50 = tpu.reciprocal %49 {approx = true} : vector<8x1xf32> -> vector<8x1xf32>
    %51 = arith.truncf %47 : vector<8x16xf32> to vector<8x16xbf16>
    %cst_24 = arith.constant dense<0.000000e+00> : vector<8x8xf32>
    %52 = tpu.matmul %51, %41, %cst_24 {dimension_numbers = #tpu.dot_dimension_numbers<[1], [0], [0], [1], [0, 0, 1, 1], [], []>} : vector<8x16xbf16>, vector<16x8xbf16>, vector<8x8xf32> -> vector<8x8xf32>
    %53 = vector.broadcast %50 : vector<8x1xf32> to vector<8x8xf32>
    %54 = arith.mulf %52, %53 : vector<8x8xf32>
    %55 = arith.truncf %54 : vector<8x8xf32> to vector<8x8xbf16>
    %56 = vector.extract_strided_slice %15 {offsets = [8, 0], sizes = [8, 32], strides = [1, 1]} : vector<32x32xbf16> to vector<8x32xbf16>
    %cst_25 = arith.constant dense<0.000000e+00> : vector<8x32xf32>
    %57 = tpu.matmul %55, %56, %cst_25 {dimension_numbers = #tpu.dot_dimension_numbers<[1], [0], [0], [1], [0, 0, 1, 1], [], []>} : vector<8x8xbf16>, vector<8x32xbf16>, vector<8x32xf32> -> vector<8x32xf32>
    %58 = arith.addf %38, %57 : vector<8x32xf32>
    %59 = vector.extract_strided_slice %12 {offsets = [0, 16], sizes = [8, 8], strides = [1, 1]} : vector<8x32xbf16> to vector<8x8xbf16>
    %60 = vector.extract_strided_slice %13 {offsets = [0, 16], sizes = [16, 8], strides = [1, 1]} : vector<16x32xbf16> to vector<16x8xbf16>
    %61 = vector.extract_strided_slice %14 {offsets = [0, 16], sizes = [16, 8], strides = [1, 1]} : vector<16x32xbf16> to vector<16x8xbf16>
    %cst_26 = arith.constant dense<0.000000e+00> : vector<8x16xf32>
    %62 = tpu.matmul %59, %60, %cst_26 {dimension_numbers = #tpu.dot_dimension_numbers<[1], [1], [0], [0], [0, 0, 1, 0], [], []>} : vector<8x8xbf16>, vector<16x8xbf16>, vector<8x16xf32> -> vector<8x16xf32>
    %cst_27 = arith.constant dense<0xFF800000> : vector<8xf32>
    %63 = vector.multi_reduction <maximumf>, %62, %cst_27 [1] : vector<8x16xf32> to vector<8xf32>
    %64 = vector.shape_cast %63 : vector<8xf32> to vector<8x1xf32>
    %65 = vector.broadcast %64 : vector<8x1xf32> to vector<8x16xf32>
    %66 = arith.subf %62, %65 : vector<8x16xf32>
    %67 = math.exp %66 : vector<8x16xf32>
    %cst_28 = arith.constant dense<0.000000e+00> : vector<8xf32>
    %68 = vector.multi_reduction <add>, %67, %cst_28 [1] : vector<8x16xf32> to vector<8xf32>
    %69 = vector.shape_cast %68 : vector<8xf32> to vector<8x1xf32>
    %70 = tpu.reciprocal %69 {approx = true} : vector<8x1xf32> -> vector<8x1xf32>
    %71 = arith.truncf %67 : vector<8x16xf32> to vector<8x16xbf16>
    %cst_29 = arith.constant dense<0.000000e+00> : vector<8x8xf32>
    %72 = tpu.matmul %71, %61, %cst_29 {dimension_numbers = #tpu.dot_dimension_numbers<[1], [0], [0], [1], [0, 0, 1, 1], [], []>} : vector<8x16xbf16>, vector<16x8xbf16>, vector<8x8xf32> -> vector<8x8xf32>
    %73 = vector.broadcast %70 : vector<8x1xf32> to vector<8x8xf32>
    %74 = arith.mulf %72, %73 : vector<8x8xf32>
    %75 = arith.truncf %74 : vector<8x8xf32> to vector<8x8xbf16>
    %76 = vector.extract_strided_slice %15 {offsets = [16, 0], sizes = [8, 32], strides = [1, 1]} : vector<32x32xbf16> to vector<8x32xbf16>
    %cst_30 = arith.constant dense<0.000000e+00> : vector<8x32xf32>
    %77 = tpu.matmul %75, %76, %cst_30 {dimension_numbers = #tpu.dot_dimension_numbers<[1], [0], [0], [1], [0, 0, 1, 1], [], []>} : vector<8x8xbf16>, vector<8x32xbf16>, vector<8x32xf32> -> vector<8x32xf32>
    %78 = arith.addf %58, %77 : vector<8x32xf32>
    %79 = vector.extract_strided_slice %12 {offsets = [0, 24], sizes = [8, 8], strides = [1, 1]} : vector<8x32xbf16> to vector<8x8xbf16>
    %80 = vector.extract_strided_slice %13 {offsets = [0, 24], sizes = [16, 8], strides = [1, 1]} : vector<16x32xbf16> to vector<16x8xbf16>
    %81 = vector.extract_strided_slice %14 {offsets = [0, 24], sizes = [16, 8], strides = [1, 1]} : vector<16x32xbf16> to vector<16x8xbf16>
    %cst_31 = arith.constant dense<0.000000e+00> : vector<8x16xf32>
    %82 = tpu.matmul %79, %80, %cst_31 {dimension_numbers = #tpu.dot_dimension_numbers<[1], [1], [0], [0], [0, 0, 1, 0], [], []>} : vector<8x8xbf16>, vector<16x8xbf16>, vector<8x16xf32> -> vector<8x16xf32>
    %cst_32 = arith.constant dense<0xFF800000> : vector<8xf32>
    %83 = vector.multi_reduction <maximumf>, %82, %cst_32 [1] : vector<8x16xf32> to vector<8xf32>
    %84 = vector.shape_cast %83 : vector<8xf32> to vector<8x1xf32>
    %85 = vector.broadcast %84 : vector<8x1xf32> to vector<8x16xf32>
    %86 = arith.subf %82, %85 : vector<8x16xf32>
    %87 = math.exp %86 : vector<8x16xf32>
    %cst_33 = arith.constant dense<0.000000e+00> : vector<8xf32>
    %88 = vector.multi_reduction <add>, %87, %cst_33 [1] : vector<8x16xf32> to vector<8xf32>
    %89 = vector.shape_cast %88 : vector<8xf32> to vector<8x1xf32>
    %90 = tpu.reciprocal %89 {approx = true} : vector<8x1xf32> -> vector<8x1xf32>
    %91 = arith.truncf %87 : vector<8x16xf32> to vector<8x16xbf16>
    %cst_34 = arith.constant dense<0.000000e+00> : vector<8x8xf32>
    %92 = tpu.matmul %91, %81, %cst_34 {dimension_numbers = #tpu.dot_dimension_numbers<[1], [0], [0], [1], [0, 0, 1, 1], [], []>} : vector<8x16xbf16>, vector<16x8xbf16>, vector<8x8xf32> -> vector<8x8xf32>
    %93 = vector.broadcast %90 : vector<8x1xf32> to vector<8x8xf32>
    %94 = arith.mulf %92, %93 : vector<8x8xf32>
    %95 = arith.truncf %94 : vector<8x8xf32> to vector<8x8xbf16>
    %96 = vector.extract_strided_slice %15 {offsets = [24, 0], sizes = [8, 32], strides = [1, 1]} : vector<32x32xbf16> to vector<8x32xbf16>
    %cst_35 = arith.constant dense<0.000000e+00> : vector<8x32xf32>
    %97 = tpu.matmul %95, %96, %cst_35 {dimension_numbers = #tpu.dot_dimension_numbers<[1], [0], [0], [1], [0, 0, 1, 1], [], []>} : vector<8x8xbf16>, vector<8x32xbf16>, vector<8x32xf32> -> vector<8x32xf32>
    %98 = arith.addf %78, %97 : vector<8x32xf32>
    %c0_36 = arith.constant 0 : index
    %c0_37 = arith.constant 0 : index
    %c0_38 = arith.constant 0 : index
    %99 = vector.load %arg13[%c0_36, %c0_37, %c0_38] : memref<1x8x32xf32, #tpu.memory_space<vmem>>, vector<1x8x32xf32>
    %100 = vector.shape_cast %99 : vector<1x8x32xf32> to vector<8x32xf32>
    %101 = vector.shape_cast %98 : vector<8x32xf32> to vector<1x8x32xf32>
    tpu.vector_store %arg13[%c0_36, %c0_37, %c0_38], %101 {strides = array<i32>} : memref<1x8x32xf32, #tpu.memory_space<vmem>>, vector<1x8x32xf32>,
    return
  }
  func.func @transform_0(%arg0: i32, %arg1: i32) -> (i32, i32, i32) {
    %c0_i32 = arith.constant 0 : i32
    %c0_i32_0 = arith.constant 0 : i32
    return %arg0, %arg1, %c0_i32 : i32, i32, i32
  }
  func.func @transform_1(%arg0: i32, %arg1: i32) -> (i32, i32, i32) {
    %c0_i32 = arith.constant 0 : i32
    %c0_i32_0 = arith.constant 0 : i32
    %c0_i32_1 = arith.constant 0 : i32
    return %arg0, %c0_i32, %c0_i32_0 : i32, i32, i32
  }
  func.func @transform_2(%arg0: i32, %arg1: i32) -> (i32, i32, i32) {
    %c0_i32 = arith.constant 0 : i32
    %c0_i32_0 = arith.constant 0 : i32
    %c0_i32_1 = arith.constant 0 : i32
    return %arg0, %c0_i32, %c0_i32_0 : i32, i32, i32
  }
  func.func @transform_3(%arg0: i32, %arg1: i32) -> (i32, i32) {
    %c0_i32 = arith.constant 0 : i32
    %c0_i32_0 = arith.constant 0 : i32
    %c0_i32_1 = arith.constant 0 : i32
    return %c0_i32, %c0_i32_0 : i32, i32
  }
  func.func @transform_4(%arg0: i32, %arg1: i32) -> (i32, i32) {
    %c0_i32 = arith.constant 0 : i32
    %c0_i32_0 = arith.constant 0 : i32
    %c0_i32_1 = arith.constant 0 : i32
    return %c0_i32, %c0_i32_0 : i32, i32
  }
  func.func @transform_5(%arg0: i32, %arg1: i32) -> (i32, i32) {
    %c0_i32 = arith.constant 0 : i32
    %c0_i32_0 = arith.constant 0 : i32
    %c0_i32_1 = arith.constant 0 : i32
    return %c0_i32, %c0_i32_0 : i32, i32
  }
  func.func @transform_6(%arg0: i32, %arg1: i32) -> (i32, i32) {
    %c0_i32 = arith.constant 0 : i32
    %c0_i32_0 = arith.constant 0 : i32
    %c0_i32_1 = arith.constant 0 : i32
    return %c0_i32, %c0_i32_0 : i32, i32
  }
  func.func @transform_7(%arg0: i32, %arg1: i32) -> (i32, i32) {
    %c0_i32 = arith.constant 0 : i32
    %c0_i32_0 = arith.constant 0 : i32
    %c0_i32_1 = arith.constant 0 : i32
    return %c0_i32, %c0_i32_0 : i32, i32
  }
  func.func @transform_8(%arg0: i32, %arg1: i32) -> (i32, i32) {
    %c0_i32 = arith.constant 0 : i32
    %c0_i32_0 = arith.constant 0 : i32
    %c0_i32_1 = arith.constant 0 : i32
    return %c0_i32, %c0_i32_0 : i32, i32
  }
  func.func @transform_9(%arg0: i32, %arg1: i32) -> (i32, i32) {
    %c0_i32 = arith.constant 0 : i32
    %c0_i32_0 = arith.constant 0 : i32
    %c0_i32_1 = arith.constant 0 : i32
    return %c0_i32, %c0_i32_0 : i32, i32
  }
  func.func @transform_10(%arg0: i32, %arg1: i32) -> (i32, i32) {
    %c0_i32 = arith.constant 0 : i32
    %c0_i32_0 = arith.constant 0 : i32
    %c0_i32_1 = arith.constant 0 : i32
    return %c0_i32, %c0_i32_0 : i32, i32
  }
  func.func @transform_11(%arg0: i32, %arg1: i32) -> (i32, i32, i32) {
    %c0_i32 = arith.constant 0 : i32
    %c0_i32_0 = arith.constant 0 : i32
    return %arg0, %arg1, %c0_i32 : i32, i32, i32
  }
}

</mosaic_0001>

<bundles_post_ra>
// kernel: multihead_cross_attention.1
= control target key start
LH: loop header
LB: loop body
LE: loop exit
PB: predicated region body
PF: predicated region fallthrough
CT: control target
= control target key end

     0   :  { %s3147_s0 = inlined_call_operand.hbm [shape: bf16[2,8,32], index: 0, kind: input, shape index: {}]   ;;  %s3148_s1 = inlined_call_operand.hbm [shape: bf16[2,16,32], index: 1, kind: input, shape index: {}]   ;;  %s3149_s2 = inlined_call_operand.hbm [shape: bf16[2,16,32], index: 2, kind: input, shape index: {}]   ;;  %s3150_s3 = inlined_call_operand.hbm [shape: bf16[32,32], index: 3, kind: input, shape index: {}]   ;;  %s3151_s4 = inlined_call_operand.hbm [shape: f32[1,32], index: 4, kind: input, shape index: {}]   ;;  %s3152_s5 = inlined_call_operand.hbm [shape: bf16[32,32], index: 5, kind: input, shape index: {}]   ;;  %s3153_s6 = inlined_call_operand.hbm [shape: f32[1,32], index: 6, kind: input, shape index: {}]   ;;  %s3154_s7 = inlined_call_operand.hbm [shape: bf16[32,32], index: 7, kind: input, shape index: {}]   ;;  %s3155_s8 = inlined_call_operand.hbm [shape: f32[1,32], index: 8, kind: input, shape index: {}]   ;;  %s3156_s9 = inlined_call_operand.hbm [shape: bf16[32,32], index: 9, kind: input, shape index: {}]   ;;  %s3157_s10 = inlined_call_operand.hbm [shape: f32[1,32], index: 10, kind: input, shape index: {}]   ;;  %s3158_s11 = inlined_call_operand.hbm [shape: f32[2,8,32], index: 11, kind: output, shape index: {}]  }
   0x1   :  { %3191 = sst [smem:[#allocation40_spill]] %s3147_s0 }
   0x2   :  { %3192 = sst [smem:[#allocation41_spill]] %s3148_s1 }
   0x3   :  { %3193 = sst [smem:[#allocation42_spill]] %s3150_s3 }
   0x4   :  { %3194 = sst [smem:[#allocation43_spill]] %s3152_s5 }
   0x5   :  { %3195 = sst [smem:[#allocation44_spill]] %s3154_s7 }
   0x6   :  { %3196 = sst [smem:[#allocation45_spill]] %s3156_s9 }
   0x7   :  { %3197 = sst [smem:[#allocation46_spill]] %s3157_s10 }
   0x8   :  { %3198 = sst [smem:[#allocation47_spill]] %s3158_s11 }
   0x9   :  { %16 = vsyncpa [#allocation5], 0 }
   0xa   :  { %18 = vsyncpa [#allocation5 + $0x1], 0 }
   0xb   :  { %19 = vsyncpa [#allocation8], 0 }
   0xc   :  { %21 = vsyncpa [#allocation8 + $0x1], 0 }
   0xd   :  { %22 = vsyncpa [#allocation11], 0 }
   0xe   :  { %23 = vsyncpa [#allocation14], 0 }
   0xf   :  { %24 = vsyncpa [#allocation17], 0 }
  0x10   :  { %25 = vsyncpa [#allocation20], 0 }
  0x11   :  { %26 = vsyncpa [#allocation6], 0 }
  0x12   :  { %28 = vsyncpa [#allocation6 + $0x1], 0  ;;  %s2572_s17 = smov 0   ;;  %s2574_s18 = smov 0  }
  0x13   :  { %s2576_s19 = smov 0   ;;  %s2578_s20 = smov 0  }
  0x14   :  { %s2580_s21 = smov 0   ;;  %s2582_s22 = smov 0  }
  0x15 LB: > { %3199 = sst [smem:[#allocation30_spill]] %s2471_s17  ;;  %s2603_s23 = sadd.s32 4294967295, %s2491_s22   ;;  %s2491_s22 = sphi %s2582_s22, %s34_s22   ;;  %s2487_s21 = sphi %s2580_s21, %s3261_s21   ;;  %s2483_s20 = sphi %s2578_s20, %s3260_s20   ;;  %s2479_s19 = sphi %s2576_s19, %s3256_s19   ;;  %s2475_s18 = sphi %s2574_s18, %s3259_s18   ;;  %s2471_s17 = sphi %s2572_s17, %s3258_s17  }
  0x16   : > { %3200 = sst [smem:[#allocation31_spill]] %s2479_s19  ;;  %p1685_p0 = scmp.ge.s32.totalorder %s2491_s22, 1 }
  0x17   : > { %3201 = sst [smem:[#allocation32_spill]] %s2483_s20  ;;  %p3163_p1 = scmp.eq.s32.totalorder %s2603_s23, 0 }
  0x18   : > { %3202 = sst [smem:[#allocation33_spill]] %s2491_s22  ;;  %p327_p2 = scmp.lt.s32.totalorder %s2491_s22, 3 }
  0x19   : > { %3203 = sst [smem:[#allocation34_spill]] %s2603_s23  ;;  %s2493_s25 = smov [#allocation10]  }
  0x1a   : > { %p2608_p3 = pnand %p1685_p0, %p327_p2  ;;  %s339_s26 = sshll.u32 %s2493_s25, 4  ;;  %s2612_s26 = int_to_ptr.vmem [resolvable:$true] %s339_s26 }
  0x1b   : > { %s2494_s28 = smov [#allocation13]   ;;  %s2495_s30 = smov [#allocation16]  }
  0x1c   : > { %s3204_s24 = scalar_select %p2608_p3, 1, 0 }
  0x1d   : > { %p1931_p4 = pneg %p2608_p3  ;;  %s363_s29 = sshll.u32 %s2494_s28, 4  ;;  %s2623_s29 = int_to_ptr.vmem [resolvable:$true] %s363_s29 }
  0x1e   : > { %3205 = sst [smem:[#allocation35_spill]] %s3204_s24  ;;  %s2625_s12 = sshll.u32 %s2495_s30, 4  ;;  %s388_s12 = int_to_ptr.vmem [resolvable:$true] %s2625_s12 }
  0x1f   : > { %p2619_p6 = pnand %p1931_p4, %p3163_p1  ;;  %s3207_s3 = sld [smem:[#allocation42_spill]] }
  0x21   : > { %s3206_s27 = scalar_select %p2619_p6, 1, 0 }
  0x22   : > { %p2635_p8 = pneg %p2619_p6 }
  0x24   : > { %s3208_s11 = scalar_select %p2635_p8, 1, 0 }
  0x25   : > { %s2075_s15 = scalar_lea.hbm %s3207_s3, 256 }
  0x26   : > { %p2076_p7 = scmp.ne.s32.totalorder %s3207_s3, %s2075_s15  ;;  %p2082_p11 = scmp.lt.u32.totalorder %s2075_s15, %s3207_s3 }
  0x28   : > { %p2078_p9 = pnand %p2635_p8, %p2076_p7 }
  0x2a   : > { %p2079_p10 = pneg %p2078_p9 }
  0x2c   : > { %p2084_p12 = pnand %p2082_p11, %p2079_p10 }
  0x2e   : > { %2087 = shalt.err (!%p2084_p12)
}
  0x2f   : > { %s2088_s13 = scalar_lea.vmem %s2612_s26, 256  ;;  %p2096_p4 = scmp.lt.s32.totalorder %s2612_s26, %s2612_s26 }
  0x30   : > { %p2089_p13 = scmp.ne.s32.totalorder %s2612_s26, %s2088_s13  ;;  %p2097_p5 = scmp.lt.s32.totalorder %s2088_s13, %s2088_s13 }
  0x32   : > { %p2091_p0 = pnand %p2089_p13, %p2635_p8  ;;  %p2098_p7 = por %p2097_p5, %p2096_p4 }
  0x34   : > { %p2092_p2 = pneg %p2091_p0 }
  0x36   : > { %p2099_p9 = pnand %p2098_p7, %p2092_p2 }
  0x38   : > { %2102 = shalt.err (!%p2099_p9)
}
  0x39   : > { %s3165_s14 = smov 64   ;;  %s3167_s15 = smov 4  }
  0x3a   : > { %1934 = dma.hbm_to_vmem [thread:$0]  (!%p2619_p6), %s3207_s3, 256, %s2612_s26, [#allocation11], %s3165_s14, %s3165_s14, %s3167_s15  }
  0x3b   : > { %s3209_s5 = sld [smem:[#allocation43_spill]] }
  0x41   : > { %s2103_s13 = scalar_lea.hbm %s3209_s5, 256 }
  0x42   : > { %p2104_p5 = scmp.ne.s32.totalorder %s3209_s5, %s2103_s13  ;;  %p2110_p12 = scmp.lt.u32.totalorder %s2103_s13, %s3209_s5 }
  0x44   : > { %p2106_p10 = pnand %p2104_p5, %p2635_p8 }
  0x46   : > { %p2107_p11 = pneg %p2106_p10 }
  0x48   : > { %p2112_p13 = pnand %p2110_p12, %p2107_p11 }
  0x4a   : > { %2115 = shalt.err (!%p2112_p13)
}
  0x4b   : > { %s2116_s26 = scalar_lea.vmem %s2623_s29, 256  ;;  %p2124_p7 = scmp.lt.s32.totalorder %s2623_s29, %s2623_s29 }
  0x4c   : > { %p2117_p0 = scmp.ne.s32.totalorder %s2623_s29, %s2116_s26  ;;  %p2125_p9 = scmp.lt.s32.totalorder %s2116_s26, %s2116_s26 }
  0x4e   : > { %p2119_p2 = pnand %p2117_p0, %p2635_p8  ;;  %p2126_p5 = por %p2125_p9, %p2124_p7 }
  0x50   : > { %p2120_p4 = pneg %p2119_p2 }
  0x52   : > { %p2127_p10 = pnand %p2126_p5, %p2120_p4 }
  0x54   : > { %2130 = shalt.err (!%p2127_p10)
}
  0x55   : > { %1940 = dma.hbm_to_vmem [thread:$0]  (!%p2619_p6), %s3209_s5, 256, %s2623_s29, [#allocation14], %s3165_s14, %s3165_s14, %s3167_s15  }
  0x56   : > { %s3210_s7 = sld [smem:[#allocation44_spill]] }
  0x5c   : > { %s2131_s16 = scalar_lea.hbm %s3210_s7, 256 }
  0x5d   : > { %p2132_p11 = scmp.ne.s32.totalorder %s3210_s7, %s2131_s16  ;;  %p2138_p0 = scmp.lt.u32.totalorder %s2131_s16, %s3210_s7 }
  0x5f   : > { %p2134_p12 = pnand %p2132_p11, %p2635_p8 }
  0x61   : > { %p2135_p13 = pneg %p2134_p12 }
  0x63   : > { %p2140_p2 = pnand %p2138_p0, %p2135_p13 }
  0x65   : > { %2143 = shalt.err (!%p2140_p2)
}
  0x66   : > { %s2144_s26 = scalar_lea.vmem %s388_s12, 256  ;;  %p2152_p5 = scmp.lt.s32.totalorder %s388_s12, %s388_s12 }
  0x67   : > { %p2145_p4 = scmp.ne.s32.totalorder %s388_s12, %s2144_s26  ;;  %p2153_p10 = scmp.lt.s32.totalorder %s2144_s26, %s2144_s26 }
  0x69   : > { %p2147_p7 = pnand %p2145_p4, %p2635_p8  ;;  %p2154_p1 = por %p2153_p10, %p2152_p5 }
  0x6b   : > { %p2148_p9 = pneg %p2147_p7 }
  0x6d   : > { %p2155_p3 = pnand %p2154_p1, %p2148_p9 }
  0x6f   : > { %2158 = shalt.err (!%p2155_p3)
}
  0x70   : > { %1946 = dma.hbm_to_vmem [thread:$0]  (!%p2619_p6), %s3210_s7, 256, %s388_s12, [#allocation17], %s3165_s14, %s3165_s14, %s3167_s15  }
  0x71   : > { %s2498_s10 = smov [#allocation19]   ;;  %s3211_s9 = sld [smem:[#allocation45_spill]] }
  0x72   : > { %s411_s20 = sshll.u32 %s2498_s10, 4  ;;  %s412_s20 = int_to_ptr.vmem [resolvable:$true] %s411_s20 }
  0x77   : > { %s2159_s25 = scalar_lea.hbm %s3211_s9, 256 }
  0x78   : > { %p2160_p1 = scmp.ne.s32.totalorder %s3211_s9, %s2159_s25  ;;  %p2166_p12 = scmp.lt.u32.totalorder %s2159_s25, %s3211_s9 }
  0x7a   : > { %p2162_p3 = pnand %p2160_p1, %p2635_p8 }
  0x7c   : > { %p2163_p11 = pneg %p2162_p3 }
  0x7e   : > { %p2168_p13 = pnand %p2166_p12, %p2163_p11 }
  0x80   : > { %2171 = shalt.err (!%p2168_p13)
}
  0x81   : > { %s2172_s12 = scalar_lea.vmem %s412_s20, 256  ;;  %p2180_p7 = scmp.lt.s32.totalorder %s412_s20, %s412_s20 }
  0x82   : > { %p2173_p0 = scmp.ne.s32.totalorder %s412_s20, %s2172_s12  ;;  %p2181_p9 = scmp.lt.s32.totalorder %s2172_s12, %s2172_s12 }
  0x84   : > { %p2175_p2 = pnand %p2173_p0, %p2635_p8  ;;  %p2182_p5 = por %p2181_p9, %p2180_p7 }
  0x86   : > { %p2176_p4 = pneg %p2175_p2 }
  0x88   : > { %p2183_p10 = pnand %p2182_p5, %p2176_p4 }
  0x8a   : > { %2186 = shalt.err (!%p2183_p10)
}
  0x8b   : > { %1952 = dma.hbm_to_vmem [thread:$0]  (!%p2619_p6), %s3211_s9, 256, %s412_s20, [#allocation20], %s3165_s14, %s3165_s14, %s3167_s15  }
  0x8c   : > { %s1684_s10 = sadd.s32 4294967294, %s2491_s22   ;;  %s46_s24 = sadd.s32 1, %s2487_s21 }
  0x8d   : > { %p48_p1 = scmp.ge.s32.totalorder %s46_s24, 2  ;;  %s55_s16 = sadd.s32 1, %s2479_s19 }
  0x8e   : > { %p62_p3 = scmp.ne.s32.totalorder %s2479_s19, %s2475_s18  ;;  %p63_p11 = scmp.eq.s32.totalorder %s2491_s22, 0 }
  0x8f   : > { %s3263_s24 = smov (%p48_p1, %s46_s24), 0  ;;  %p68_p13 = scmp.ne.s32.totalorder %s2475_s18, %s2471_s17 }
  0x90   : > { %3212 = sst [smem:[#allocation36_spill]] %s3263_s24  ;;  %p2736_p12 = por %p63_p11, %p62_p3 }
  0x91   : > { %s50_s20 = ssub.s32 %s2487_s21, %s3263_s24  ;;  %p314_p0 = scmp.eq.s32.totalorder %s2603_s23, 1 }
  0x92   : > { %p53_p2 = scmp.eq.s32.totalorder %s50_s20, 0  ;;  %p3214_p4 = scmp.eq.s32.totalorder %s2603_s23, 0 }
  0x93   : > { %p2751_p9 = por %p314_p0, %p62_p3  ;;  %p320_p5 = scmp.eq.s32.totalorder %s1684_s10, 1 }
  0x94   : > { %p2747_p7 = por %p3214_p4, %p68_p13  ;;  %p1978_p1 = scmp.lt.s32.totalorder %s2491_s22, 2 }
  0x95   : > { %s3216_s30 = scalar_select %p2751_p9, 1, 0 }
  0x96   : > { %s3215_s28 = scalar_select %p2747_p7, 1, 0 }
  0x97   : > { %3217 = sst [smem:[#allocation37_spill]] %s3216_s30  ;;  %p2758_p10 = por %p320_p5, %p68_p13 }
  0x98   : > { %s2756_s13 = scalar_select %p53_p2, %s2479_s19, %s55_s16  }
  0x99   : > { %s3219_s26 = scalar_select %p2758_p10, 1, 0 }
  0x9a   : > { %3218 = sst [smem:[#allocation38_spill]] %s2756_s13  ;;  %s2764_s12 = sand.u32 1, %s2479_s19  }
  0x9b   : > { %3220 = sst [smem:[#allocation39_spill]] %s3219_s26  ;;  %s455_s29 = sand.u32 1, %s2491_s22  }
  0x9c   : > { %p2769_p11 = pnand %p1978_p1, %p2736_p12  ;;  %s3169_s20 = sshll.u32 %s2764_s12, 3 }
  0x9d   : > { %s3170_s10 = sshll.u32 %s2487_s21, 7  ;;  %s3222_s1 = sld [smem:[#allocation41_spill]] }
  0x9e   : > { %s3221_s0 = scalar_select %p2769_p11, 1, 0 }
  0x9f   : > { %s459_s3 = scalar_lea.vmem [#allocation7], %s3169_s20  ;;  %s2786_s5 = scalar_lea.sflag [#allocation8], %s455_s29 }
  0xa0   : > { %s466_s25 = sshll.u32 %s459_s3, 4  ;;  %p2792_p12 = pneg %p2769_p11  ;;  %s2784_s25 = int_to_ptr.vmem [resolvable:$true] %s466_s25 }
  0xa2   : > { %s3223_s9 = scalar_select %p2792_p12, 1, 0 }
  0xa3   : > { %s2780_s15 = scalar_lea.hbm %s3222_s1, %s3170_s10  ;;  %s2192_s20 = scalar_lea.hbm %s3222_s1, 256 }
  0xa4   : > { %s2187_s7 = scalar_lea.hbm %s2780_s15, 128  ;;  %p2193_p2 = scmp.lt.u32.totalorder %s2780_s15, %s3222_s1 }
  0xa5   : > { %p2188_p3 = scmp.ne.s32.totalorder %s2780_s15, %s2187_s7  ;;  %p2194_p4 = scmp.lt.u32.totalorder %s2192_s20, %s2187_s7 }
  0xa6   : > { %p2196_p1 = scmp.lt.u32.totalorder %s2187_s7, %s2780_s15 }
  0xa7   : > { %p2190_p13 = pnand %p2792_p12, %p2188_p3  ;;  %p2195_p5 = por %p2194_p4, %p2193_p2 }
  0xa9   : > { %p2191_p0 = pneg %p2190_p13  ;;  %p2197_p10 = por %p2196_p1, %p2195_p5 }
  0xab   : > { %p2198_p9 = pnand %p2197_p10, %p2191_p0 }
  0xad   : > { %2201 = shalt.err (!%p2198_p9)
}
  0xae   : > { %s2202_s29 = scalar_lea.vmem %s2784_s25, 128  ;;  %s2499_s14 = smov [#allocation7]  }
  0xaf   : > { %p2203_p3 = scmp.ne.s32.totalorder %s2784_s25, %s2202_s29  ;;  %s2207_s16 = sshll.u32 %s2499_s14, 4  ;;  %s2208_s16 = int_to_ptr.vmem [resolvable:$false] %s2207_s16 }
  0xb0   : > { %s2209_s10 = scalar_lea.vmem %s2208_s16, 256  ;;  %p2210_p6 = scmp.lt.s32.totalorder %s2784_s25, %s2208_s16 }
  0xb1   : > { %p2205_p13 = pnand %p2203_p3, %p2792_p12  ;;  %p2211_p8 = scmp.lt.s32.totalorder %s2209_s10, %s2202_s29 }
  0xb3   : > { %p2206_p7 = pneg %p2205_p13  ;;  %p2212_p2 = por %p2211_p8, %p2210_p6 }
  0xb5   : > { %p2213_p4 = pnand %p2212_p2, %p2206_p7 }
  0xb7   : > { %2216 = shalt.err (!%p2213_p4)
}
  0xb8   : > { %s3224_s7 = smov 4   ;;  %s3225_s20 = smov 64  }
  0xb9   : > { %1962 = dma.hbm_to_vmem [thread:$0]  (!%p2769_p11), %s2780_s15, 128, %s2784_s25, %s2786_s5, %s3225_s20, %s3225_s20, %s3224_s7  }
  0xba   : > { %s3226_s3 = sshll.u32 %s2487_s21, 7  ;;  %s3227_s16 = sshll.u32 %s2764_s12, 3 }
  0xbb   : > { %s2824_s29 = scalar_lea.hbm %s3149_s2, %s3226_s3  ;;  %s2828_s10 = scalar_lea.vmem [#allocation9], %s3227_s16 }
  0xbc   : > { %s487_s24 = sshll.u32 %s2828_s10, 4  ;;  %s2500_s13 = smov [#allocation12]   ;;  %s2912_s24 = int_to_ptr.vmem [resolvable:$true] %s487_s24 }
  0xbd   : > { %s353_s19 = sshll.u32 %s2500_s13, 4  ;;  %s2501_s22 = smov [#allocation15]   ;;  %s354_s19 = int_to_ptr.vmem [resolvable:$true] %s353_s19 }
  0xbe   : > { %s377_s26 = sshll.u32 %s2501_s22, 4  ;;  %s2217_s15 = scalar_lea.hbm %s3151_s4, 16  ;;  %s378_s26 = int_to_ptr.vmem [resolvable:$true] %s377_s26 }
  0xbf   : > { %p2218_p6 = scmp.ne.s32.totalorder %s3151_s4, %s2217_s15  ;;  %p3228_p8 = scmp.ne.s32.totalorder %s3208_s11, 0 }
  0xc0   : > { %p2224_p10 = scmp.lt.u32.totalorder %s2217_s15, %s3151_s4 }
  0xc1   : > { %p2220_p7 = pnand %p2218_p6, %p3228_p8 }
  0xc3   : > { %p2221_p9 = pneg %p2220_p7 }
  0xc5   : > { %p2226_p0 = pnand %p2224_p10, %p2221_p9 }
  0xc7   : > { %2229 = shalt.err (!%p2226_p0)
}
  0xc8   : > { %s2230_s13 = scalar_lea.vmem %s354_s19, 16  ;;  %s2237_s17 = scalar_lea.vmem %s354_s19, 32 }
  0xc9   : > { %p2231_p5 = scmp.ne.s32.totalorder %s354_s19, %s2230_s13  ;;  %p2238_p13 = scmp.lt.s32.totalorder %s354_s19, %s354_s19 }
  0xca   : > { %p2239_p2 = scmp.lt.s32.totalorder %s2237_s17, %s2230_s13 }
  0xcb   : > { %p2233_p1 = pnand %p2231_p5, %p3228_p8 }
  0xcc   : > { %p2240_p4 = por %p2239_p2, %p2238_p13 }
  0xcd   : > { %p2234_p3 = pneg %p2233_p1 }
  0xcf   : > { %p2241_p11 = pnand %p2240_p4, %p2234_p3 }
  0xd1   : > { %2244 = shalt.err (!%p2241_p11)
}
  0xd2   : > { %p3229_p6 = scmp.ne.s32.totalorder %s3206_s27, 0  ;;  %s2245_s16 = scalar_lea.hbm %s3153_s6, 16 }
  0xd3   : > { %p2246_p7 = scmp.ne.s32.totalorder %s3153_s6, %s2245_s16  ;;  %p2252_p11 = scmp.lt.u32.totalorder %s2245_s16, %s3153_s6 }
  0xd4   : > { %1937 = dma.hbm_to_vmem [thread:$0]  (!%p3229_p6), %s3151_s4, 16, %s354_s19, [#allocation11]  }
  0xd5   : > { %p2248_p9 = pnand %p2246_p7, %p3228_p8 }
  0xd7   : > { %p2249_p10 = pneg %p2248_p9 }
  0xd9   : > { %p2254_p0 = pnand %p2252_p11, %p2249_p10 }
  0xdb   : > { %2257 = shalt.err (!%p2254_p0)
}
  0xdc   : > { %s2258_s13 = scalar_lea.vmem %s378_s26, 16  ;;  %s2265_s19 = scalar_lea.vmem %s378_s26, 32 }
  0xdd   : > { %p2259_p5 = scmp.ne.s32.totalorder %s378_s26, %s2258_s13  ;;  %p2266_p13 = scmp.lt.s32.totalorder %s378_s26, %s378_s26 }
  0xde   : > { %p2267_p2 = scmp.lt.s32.totalorder %s2265_s19, %s2258_s13 }
  0xdf   : > { %p2261_p1 = pnand %p2259_p5, %p3228_p8 }
  0xe0   : > { %p2268_p4 = por %p2267_p2, %p2266_p13 }
  0xe1   : > { %p2262_p3 = pneg %p2261_p1 }
  0xe3   : > { %p2269_p12 = pnand %p2268_p4, %p2262_p3 }
  0xe5   : > { %2272 = shalt.err (!%p2269_p12)
}
  0xe6   : > { %1943 = dma.hbm_to_vmem [thread:$0]  (!%p3229_p6), %s3153_s6, 16, %s378_s26, [#allocation14]  }
  0xe7   : > { %s2502_s23 = smov [#allocation18]   ;;  %s2503_s14 = smov [#allocation21]  }
  0xe8   : > { %s401_s30 = sshll.u32 %s2502_s23, 4  ;;  %s425_s16 = sshll.u32 %s2503_s14, 4  ;;  %s402_s30 = int_to_ptr.vmem [resolvable:$true] %s401_s30  ;;  %s426_s16 = int_to_ptr.vmem [resolvable:$true] %s425_s16 }
  0xe9   : > { %s2273_s1 = scalar_lea.hbm %s3155_s8, 16 }
  0xea   : > { %p2274_p12 = scmp.ne.s32.totalorder %s3155_s8, %s2273_s1  ;;  %p2280_p10 = scmp.lt.u32.totalorder %s2273_s1, %s3155_s8 }
  0xec   : > { %p2276_p7 = pnand %p2274_p12, %p3228_p8 }
  0xee   : > { %p2277_p9 = pneg %p2276_p7 }
  0xf0   : > { %p2282_p11 = pnand %p2280_p10, %p2277_p9 }
  0xf2   : > { %2285 = shalt.err (!%p2282_p11)
}
  0xf3   : > { %s2286_s26 = scalar_lea.vmem %s402_s30, 16  ;;  %s2293_s22 = scalar_lea.vmem %s402_s30, 32 }
  0xf4   : > { %p2287_p0 = scmp.ne.s32.totalorder %s402_s30, %s2286_s26  ;;  %p2294_p3 = scmp.lt.s32.totalorder %s402_s30, %s402_s30 }
  0xf5   : > { %p2295_p13 = scmp.lt.s32.totalorder %s2293_s22, %s2286_s26 }
  0xf6   : > { %p2289_p5 = pnand %p2287_p0, %p3228_p8 }
  0xf7   : > { %p2296_p2 = por %p2295_p13, %p2294_p3 }
  0xf8   : > { %p2290_p1 = pneg %p2289_p5 }
  0xfa   : > { %p2297_p4 = pnand %p2296_p2, %p2290_p1 }
  0xfc   : > { %2300 = shalt.err (!%p2297_p4)
}
  0xfd   : > { %1949 = dma.hbm_to_vmem [thread:$0]  (!%p3229_p6), %s3155_s8, 16, %s402_s30, [#allocation17]  }
  0xfe   : > { %s3230_s1 = sld [smem:[#allocation46_spill]] }
 0x104   : > { %s2301_s3 = scalar_lea.hbm %s3230_s1, 16 }
 0x105   : > { %p2302_p12 = scmp.ne.s32.totalorder %s3230_s1, %s2301_s3  ;;  %p2308_p10 = scmp.lt.u32.totalorder %s2301_s3, %s3230_s1 }
 0x107   : > { %p2304_p7 = pnand %p2302_p12, %p3228_p8 }
 0x109   : > { %p2305_p9 = pneg %p2304_p7 }
 0x10b   : > { %p2310_p11 = pnand %p2308_p10, %p2305_p9 }
 0x10d   : > { %2313 = shalt.err (!%p2310_p11)
}
 0x10e   : > { %s2314_s22 = scalar_lea.vmem %s426_s16, 16  ;;  %s2321_s30 = scalar_lea.vmem %s426_s16, 32 }
 0x10f   : > { %p2315_p0 = scmp.ne.s32.totalorder %s426_s16, %s2314_s22  ;;  %p2322_p3 = scmp.lt.s32.totalorder %s426_s16, %s426_s16 }
 0x110   : > { %p2323_p13 = scmp.lt.s32.totalorder %s2321_s30, %s2314_s22 }
 0x111   : > { %p2317_p5 = pnand %p2315_p0, %p3228_p8 }
 0x112   : > { %p2324_p2 = por %p2323_p13, %p2322_p3 }
 0x113   : > { %p2318_p1 = pneg %p2317_p5 }
 0x115   : > { %p2325_p4 = pnand %p2324_p2, %p2318_p1 }
 0x117   : > { %2328 = shalt.err (!%p2325_p4)
}
 0x118   : > { %1955 = dma.hbm_to_vmem [thread:$0]  (!%p3229_p6), %s3230_s1, 16, %s426_s16, [#allocation20]  }
 0x119   : > { %s1695_s11 = sshll.u32 %s2764_s12, 2  ;;  %s1696_s15 = sshll.u32 %s2487_s21, 6 }
 0x11a   : > { %s3231_s13 = sld [smem:[#allocation40_spill]]  ;;  %s440_s27 = scalar_lea.vmem [#allocation4], %s1695_s11 }
 0x11b   : > { %s448_s17 = sshll.u32 %s440_s27, 4  ;;  %s437_s26 = scalar_lea.sflag [#allocation5], %s2764_s12  ;;  %s449_s17 = int_to_ptr.vmem [resolvable:$true] %s448_s17 }
 0x11c   : > { %p3232_p6 = scmp.ne.s32.totalorder %s3223_s9, 0 }
 0x120   : > { %s2908_s19 = scalar_lea.hbm %s3231_s13, %s1696_s15  ;;  %s2334_s23 = scalar_lea.hbm %s3231_s13, 128 }
 0x121   : > { %s2329_s22 = scalar_lea.hbm %s2908_s19, 64  ;;  %p2335_p9 = scmp.lt.u32.totalorder %s2908_s19, %s3231_s13 }
 0x122   : > { %p2330_p8 = scmp.ne.s32.totalorder %s2908_s19, %s2329_s22  ;;  %p2336_p10 = scmp.lt.u32.totalorder %s2334_s23, %s2329_s22 }
 0x123   : > { %p2338_p0 = scmp.lt.u32.totalorder %s2329_s22, %s2908_s19 }
 0x124   : > { %p2332_p12 = pnand %p2330_p8, %p3232_p6  ;;  %p2337_p11 = por %p2336_p10, %p2335_p9 }
 0x126   : > { %p2333_p7 = pneg %p2332_p12  ;;  %p2339_p5 = por %p2338_p0, %p2337_p11 }
 0x128   : > { %p2340_p1 = pnand %p2339_p5, %p2333_p7 }
 0x12a   : > { %2343 = shalt.err (!%p2340_p1)
}
 0x12b   : > { %s2344_s12 = scalar_lea.vmem %s449_s17, 64  ;;  %s2504_s11 = smov [#allocation4]  }
 0x12c   : > { %p2345_p3 = scmp.ne.s32.totalorder %s449_s17, %s2344_s12  ;;  %s2349_s15 = sshll.u32 %s2504_s11, 4  ;;  %s2350_s15 = int_to_ptr.vmem [resolvable:$false] %s2349_s15 }
 0x12d   : > { %s2351_s25 = scalar_lea.vmem %s2350_s15, 128  ;;  %p2352_p4 = scmp.lt.s32.totalorder %s449_s17, %s2350_s15 }
 0x12e   : > { %p2347_p13 = pnand %p2345_p3, %p3232_p6  ;;  %p2353_p8 = scmp.lt.s32.totalorder %s2351_s25, %s2344_s12 }
 0x130   : > { %p2348_p2 = pneg %p2347_p13  ;;  %p2354_p12 = por %p2353_p8, %p2352_p4 }
 0x132   : > { %p2355_p9 = pnand %p2354_p12, %p2348_p2 }
 0x134   : > { %2358 = shalt.err (!%p2355_p9)
}
 0x135   : > { %p3233_p10 = scmp.ne.s32.totalorder %s3221_s0, 0  ;;  %s2359_s3 = scalar_lea.hbm %s2824_s29, 128 }
 0x136   : > { %p2360_p7 = scmp.ne.s32.totalorder %s2824_s29, %s2359_s3  ;;  %s2364_s16 = scalar_lea.hbm %s3149_s2, 256 }
 0x137   : > { %1959 = dma.hbm_to_vmem [thread:$0]  (!%p3233_p10), %s2908_s19, 64, %s449_s17, %s437_s26  }
 0x138   : > { %p2362_p11 = pnand %p2360_p7, %p3232_p6  ;;  %p2365_p5 = scmp.lt.u32.totalorder %s2824_s29, %s3149_s2 }
 0x139   : > { %p2366_p1 = scmp.lt.u32.totalorder %s2364_s16, %s2359_s3  ;;  %p2368_p13 = scmp.lt.u32.totalorder %s2359_s3, %s2824_s29 }
 0x13a   : > { %p2363_p0 = pneg %p2362_p11 }
 0x13b   : > { %p2367_p3 = por %p2366_p1, %p2365_p5 }
 0x13d   : > { %p2369_p2 = por %p2368_p13, %p2367_p3 }
 0x13f   : > { %p2370_p4 = pnand %p2369_p2, %p2363_p0 }
 0x141   : > { %2373 = shalt.err (!%p2370_p4)
}
 0x142   : > { %s2374_s19 = scalar_lea.vmem %s2912_s24, 128  ;;  %s2505_s17 = smov [#allocation9]  }
 0x143   : > { %p2375_p8 = scmp.ne.s32.totalorder %s2912_s24, %s2374_s19  ;;  %s2379_s26 = sshll.u32 %s2505_s17, 4  ;;  %s2380_s26 = int_to_ptr.vmem [resolvable:$false] %s2379_s26 }
 0x144   : > { %s2381_s10 = scalar_lea.vmem %s2380_s26, 256  ;;  %p2382_p7 = scmp.lt.s32.totalorder %s2912_s24, %s2380_s26 }
 0x145   : > { %p2377_p12 = pnand %p2375_p8, %p3232_p6  ;;  %p2383_p11 = scmp.lt.s32.totalorder %s2381_s10, %s2374_s19 }
 0x147   : > { %p2378_p9 = pneg %p2377_p12  ;;  %p2384_p5 = por %p2383_p11, %p2382_p7 }
 0x149   : > { %p2385_p1 = pnand %p2384_p5, %p2378_p9 }
 0x14b   : > { %2388 = shalt.err (!%p2385_p1)
}
 0x14c   : > { %1965 = dma.hbm_to_vmem [thread:$0]  (!%p3233_p10), %s2824_s29, 128, %s2912_s24, %s2786_s5, %s3225_s20, %s3225_s20, %s3224_s7  }
 0x14d   : > { %s3234_s9 = sld [smem:[#allocation35_spill]] }
 0x153   : > { %p3235_p6 = scmp.ne.s32.totalorder %s3234_s9, 0 }
 0x154   : > { %s2960_s14 = sand.u32 (!%p3235_p6), 1, %s2475_s18   ;;  %p3236_p0 = scmp.ne.s32.totalorder (!%p3235_p6), %s3215_s28, 0 }
 0x155   : > { %499 = sbr.rel (%p3235_p6) target bundleno = 2199 (0x897), region = 64  ;;  %s1704_s12 = sshll.u32 (!%p3235_p6), %s2960_s14, 2 }
 0x156   : > { %s502_s11 = scalar_lea.sflag (!%p3235_p6), [#allocation5], %s2960_s14  ;;  %s2964_s15 = scalar_lea.vmem (!%p3235_p6), [#allocation4], %s1704_s12 }
 0x15c   : > { %2442 = dma.done.wait (%p3236_p0), %s502_s11, 64  }
 0x15d   : > { %2444 = vsyncadd (%p3236_p0), %s502_s11, 4294967232  ;;  %s3237_s0 = sld [smem:[#allocation34_spill]]  ;;  %s2972_s24 = sshll.u32 %s2960_s14, 3 }
 0x15e   : > { %s514_s20 = scalar_lea.vmem [#allocation7], %s2972_s24 }
 0x163   : > { %s510_s5 = sand.u32 1, %s3237_s0  }
 0x164   : > { %s511_s7 = scalar_lea.sflag [#allocation8], %s510_s5 }
 0x165   : > { %2446 = dma.done.wait (%p3236_p0), %s511_s7, 256  }
 0x166   : > { %2448 = vsyncadd (%p3236_p0), %s511_s7, 4294967040  ;;  %s523_s29 = scalar_lea.vmem [#allocation9], %s2972_s24  ;;  %p3238_p10 = scmp.eq.s32.totalorder %s3237_s0, 0 }
 0x168   : > { %2450 = dma.done.wait (%p3238_p10), [#allocation11], 272   ;;  %p3239_p3 = pmov %p3238_p10 }
 0x16a   : > { %2452 = vsyncadd (%p3239_p3), [#allocation11], 4294967024  ;;  %p3240_p13 = pmov %p3239_p3 }
 0x16b   : > { %p3241_p2 = pmov %p3239_p3 }
 0x16c   : > { %2454 = dma.done.wait (%p3240_p13), [#allocation14], 272  }
 0x16d   : > { %2456 = vsyncadd (%p3241_p2), [#allocation14], 4294967024  ;;  %p3242_p4 = pmov %p3241_p2 }
 0x16e   : > { %p3243_p8 = pmov %p3241_p2 }
 0x16f   : > { %2458 = dma.done.wait (%p3242_p4), [#allocation17], 272  }
 0x170   : > { %2460 = vsyncadd (%p3243_p8), [#allocation17], 4294967024  ;;  %p3244_p12 = pmov %p3241_p2 }
 0x171   : > { %p3245_p9 = pmov %p3241_p2 }
 0x172   : > { %2462 = dma.done.wait (%p3244_p12), [#allocation20], 272  }
 0x173   : > { %2464 = vsyncadd (%p3245_p9), [#allocation20], 4294967024  ;;  %v2506_v0 = vmov 0.0   ;;  %vm2507_vm0 = vmmov 0   ;;  %v2051_v1 = vld [vmem:[#allocation13] sm:$0xff]   ;;  %v2052_v2 = vld [vmem:[#allocation13 + $0x8] sm:$0xff]  }
 0x174   : > { %1782 = vmatprep.subr.bf16.mxu0 %v2506_v0  ;;  %1786 = vmatprep.mubr.msk.bf16.mxu0 %vm2507_vm0, %v2506_v0  ;;  %v2053_v3 = vld [vmem:[%s514_s20] sm:$0xff]   ;;  %vm641_vm1 = vcmask 261120   ;;  %v762_v6 = vld [vmem:[%s2964_s15] sm:$0xf]  ;;  %v1726_v18 = vld [vmem:[#allocation12] ss:$0 sm:$0xff] }
 0x175   : > { %1790 = vmatprep.subr.bf16.mxu1 %v2506_v0  ;;  %1794 = vmatprep.mubr.msk.bf16.mxu1 %vm2507_vm0, %v2506_v0  ;;  %v2054_v4 = vld [vmem:[#allocation10] sm:$0xff]   ;;  %v2055_v5 = vld [vmem:[#allocation10 + $0x8] sm:$0xff]   ;;  %v2058_v9 = vld [vmem:[%s523_s29] sm:$0xff]   ;;  %vm845_vm2 = vcmask 64512   ;;  %s2508_s28 = smov 120   ;;  %s2509_s25 = smov 112  }
 0x176   : > { %1783 = vmatpush3.bf16.msra.mxu0 %v2051_v1  ;;  %v2056_v7 = vld [vmem:[#allocation16] sm:$0xff]   ;;  %v2057_v8 = vld [vmem:[#allocation16 + $0x8] sm:$0xff]   ;;  %v1716_v10 = vld [vmem:[#allocation15] ss:$0 sm:$0xff]  ;;  %vm892_vm3 = vcmask 130048   ;;  %s2510_s3 = smov 104  }
 0x177   : > { %1784 = vmatprep.subr.bf16.mxu0 %v2506_v0  ;;  %1791 = vmatpush3.bf16.msra.mxu1 %v2056_v7  ;;  %v1721_v28 = vld [vmem:[#allocation18] ss:$0 sm:$0xff]  ;;  %v834_v55 = vld [vmem:[#allocation19] sm:$0xf]  ;;  %vm952_vm4 = vcmask 1043456   ;;  %s3246_s27 = sld [smem:[#allocation32_spill]] }
 0x178   : > { %1792 = vmatprep.subr.bf16.mxu1 %v2506_v0  ;;  %v954_v56 = vsel %vm952_vm4, %v834_v55, 0  ;;  %s3247_s22 = sld [smem:[#allocation37_spill]]  ;;  %s603_s30 = scalar_lea.vmem [#allocation22], %s2972_s24 }
 0x179   : > { %s1484_s23 = sshll.u32 %s603_s30, 4  ;;  %s3248_s26 = sld [smem:[#allocation47_spill]]  ;;  %s3099_s23 = int_to_ptr.vmem [resolvable:$true] %s1484_s23 }
 0x17a   : > { %1785 = vmatpush3.bf16.msra.mxu0 %v2052_v2  ;;  %s1470_s9 = scalar_lea.sflag [#allocation6], %s2960_s14  ;;  %s2389_s12 = scalar_lea.vmem %s3099_s23, 128 }
 0x17b   : > { %1798 = vmatprep.subr.bf16.mxu0 %v2506_v0  ;;  %1793 = vmatpush3.bf16.msra.mxu1 %v2057_v8  ;;  %p2390_p7 = scmp.ne.s32.totalorder %s3099_s23, %s2389_s12  ;;  %s2511_s11 = smov [#allocation22]  }
 0x17c   : > { %1806 = vmatprep.subr.bf16.mxu1 %v2506_v0  ;;  %s2393_s15 = sshll.u32 %s2511_s11, 4  ;;  %s2394_s15 = int_to_ptr.vmem [resolvable:$false] %s2393_s15 }
 0x17d   : > { %1787 = vmatmul.mubr.msk.bf16.vlgmr.msra.gmra.mrb[0].mxu0 %vm641_vm1, %v2053_v3  ;;  %s1744_s16 = sshll.u32 %s3246_s27, 7  ;;  %s2395_s0 = scalar_lea.vmem %s2394_s15, 256 }
 0x17e   : > { %1799 = vmatpush3.bf16.msra.mxu0 %v2054_v4  ;;  %1802 = vmatprep.mubr.msk.bf16.mxu0 %vm2507_vm0, %v2506_v0  ;;  %p3249_p11 = scmp.ne.s32.totalorder %s3247_s22, 0  ;;  %p2396_p6 = scmp.lt.s32.totalorder %s3099_s23, %s2394_s15 }
 0x17f   : > { %1800 = vmatprep.subr.bf16.mxu0 %v2506_v0  ;;  %1795 = vmatmul.mubr.msk.bf16.vlgmr.msra.gmra.mrb[0].mxu1 %vm641_vm1, %v2058_v9  ;;  %s3097_s10 = scalar_lea.hbm %s3248_s26, %s1744_s16  ;;  %p2397_p0 = scmp.lt.s32.totalorder %s2395_s0, %s2389_s12 }
 0x180   : > { %1808 = vmatprep.mubr.msk.bf16.mxu1 %vm2507_vm0, %v2506_v0  ;;  %p2391_p5 = pnand %p2390_p7, %p3249_p11 }
 0x181   : > { %p2398_p10 = por %p2397_p0, %p2396_p6 }
 0x182   : > { %1801 = vmatpush3.bf16.msra.mxu0 %v2055_v5  ;;  %p2392_p1 = pneg %p2391_p5 }
 0x183   : > { %1812 = vmatprep.subr.bf16.mxu0 %v2506_v0 }
 0x184   : > { %p2399_p3 = pnand %p2398_p10, %p2392_p1 }
 0x185   : > { %1803 = vmatmul.mubr.msk.bf16.vlgmr.msra.gmra.mrb[4].mxu0 %vm641_vm1, %v762_v6 }
 0x186   : > { %1814 = vmatprep.mubr.msk.bf16.mxu0 %vm2507_vm0, %v2506_v0 }
 0x250   : > { %v679_v11 = vpop.f32.mrb[0].mxu0 }
 0x251   : > { %v1788_v12 = vpop.f32.mrb[1].mxu0  ;;  %v680_v14 = vadd.f32 %v1716_v10, %v679_v11 }
 0x252   : > { %v682_v13 = vpop.f32.mrb[2].mxu0  ;;  %v751_v29 = vpop.f32.mrb[0].mxu1 }
 0x253   : > { %v683_v15 = vadd.f32 %v1716_v10, %v682_v13  ;;  %v1789_v16 = vpop.f32.mrb[3].mxu0  ;;  %v752_v30 = vadd.f32 %v1721_v28, %v751_v29  ;;  %v1796_v31 = vpop.f32.mrb[1].mxu1 }
 0x254   : > { %v754_v32 = vpop.f32.mrb[2].mxu1 }
 0x255   : > { %v758_v17 = vpack.c.bf16 %v683_v15, %v680_v14  ;;  %v755_v33 = vadd.f32 %v1721_v28, %v754_v32  ;;  %v1797_v34 = vpop.f32.mrb[3].mxu1  ;;  %v835_v28 = vld [vmem:[#allocation19 + $0x4] sm:$0xf] }
 0x256   : > { %v1113_v29 = vsel %vm952_vm4, %v835_v28, 0 }
 0x257   : > { %759 = vst.msk [vmem:[#allocation2] sm:$0xff] %vm641_vm1, %v758_v17  ;;  %v760_v35 = vpack.c.bf16 %v755_v33, %v752_v30 }
 0x258   : > { %v824_v19 = vpop.f32.mrb[4].mxu0 }
 0x259   : > { %v825_v20 = vadd.f32 %v1726_v18, %v824_v19  ;;  %v1804_v21 = vpop.f32.mrb[5].mxu0  ;;  %761 = vst.msk [vmem:[#allocation3] sm:$0xff] %vm641_vm1, %v760_v35 }
 0x25a   : > { %v827_v22 = vpop.f32.mrb[6].mxu0 }
 0x25b   : > { %v830_v23 = vmul.f32 0.35355338, %v825_v20  ;;  %v1805_v24 = vpop.f32.mrb[7].mxu0 }
 0x25d   : > { %v831_v25 = vpack.c.bf16 %v830_v23, %v830_v23 }
 0x25e   : > { %v832_v26 = vld [vmem:[#allocation2] sm:$0xff] }
 0x25f   : > { %998 = vrot.lane.b32.xlu1 %v831_v25, %s2508_s28  ;;  %v850_v27 = vsel %vm845_vm2, %v832_v26, 0 }
 0x260   : > { %1807 = vmatpush3.bf16.xpose.msra.mxu1 %v850_v27  ;;  %v3028_v36 = vld [vmem:[#allocation3] sm:$0xff] }
 0x261   : > { %1818 = vmatprep.subr.bf16.mxu1 %v2506_v0  ;;  %1813 = vmatpush3.bf16.msra.mxu0 %v3028_v36 }
 0x262   : > { %1824 = vmatprep.subr.bf16.mxu0 %v2506_v0 }
 0x263   : > { %1158 = vrot.lane.b32.xlu1 %v832_v26, %s2509_s25 }
 0x267   : > { %1809 = vmatmul.mubr.msk.bf16.vlgmr.msra.gmra.mrb[4].mxu1 %vm845_vm2, %v831_v25  ;;  %1156 = vrot.lane.b32.xlu1 %v831_v25, %s2509_s25 }
 0x268   : > { %1820 = vmatprep.mubr.msk.bf16.mxu1 %vm2507_vm0, %v2506_v0  ;;  %1819 = vmatpush3.bf16.msra.mxu1 %v954_v56 }
 0x269   : > { %1830 = vmatprep.subr.bf16.mxu1 %v2506_v0 }
 0x2d1   : > { %v999_v49 = vpop.permute.xlu1 %998 }
 0x2d5   : > { %v1159_v51 = vpop.permute.xlu1 %1158 }
 0x2d6   : > { %v1164_v52 = vsel %vm845_vm2, %v1159_v51, 0 }
 0x2d9   : > { %v1157_v53 = vpop.permute.xlu1 %1156 }
 0x33a   : > { %v886_v37 = vpop.f32.mrb[4].mxu1 }
 0x33b   : > { %v1810_v38 = vpop.f32.mrb[5].mxu1  ;;  %v893_v39 = vsel %vm892_vm3, %v886_v37, -inf }
 0x33c   : > { %894 = vmax.xlane.f32.xlu0 %v893_v39  ;;  %v889_v40 = vpop.f32.mrb[6].mxu1  ;;  %v836_v39 = vld [vmem:[#allocation19 + $0x8] sm:$0xf] }
 0x33d   : > { %v1811_v41 = vpop.f32.mrb[7].mxu1 }
 0x352   : > { %1001 = vrot.lane.b32.xlu0 %v832_v26, %s2508_s28 }
 0x356   : > { %1217 = vrot.lane.b32.xlu0 %v3028_v36, %s2509_s25 }
 0x35a   : > { %1314 = vrot.lane.b32.xlu0 %v832_v26, %s2510_s3 }
 0x35e   : > { %1312 = vrot.lane.b32.xlu0 %v831_v25, %s2510_s3 }
 0x3c9   : > { %v895_v42 = vpop.xlane.xlu0 %894 }
 0x3ca   : > { %v896_v43 = vsub.f32 %v886_v37, %v895_v42 }
 0x3cc   : > { %v897_v44 = vmul.f32 1.442695, %v896_v43 }
 0x3cd   : > { %v1002_v46 = vpop.permute.xlu0 %1001 }
 0x3ce   : > { %2059 = vpow2.f32 %v897_v44  ;;  %v1007_v50 = vsel %vm845_vm2, %v1002_v46, 0 }
 0x3d1   : > { %v1218_v54 = vpop.permute.xlu0 %1217 }
 0x3d5   : > { %v1315_v57 = vpop.permute.xlu0 %1314 }
 0x3d6   : > { %v1320_v24 = vsel %vm845_vm2, %v1315_v57, 0 }
 0x3d8   : > { %v2060_v45 = vpop.eup %2059 }
 0x3d9   : > { %v899_v47 = vsel %vm892_vm3, %v2060_v45, 0.0  ;;  %v903_v48 = vpack.c.bf16 %v2060_v45, %v2060_v45  ;;  %v1313_v58 = vpop.permute.xlu0 %1312  ;;  %v1269_v45 = vsel %vm952_vm4, %v836_v39, 0 }
 0x3da   : > { %900 = vadd.xlane.f32.xlu0 %v899_v47 }
 0x3db   : > { %1815 = vmatmul.mubr.msk.bf16.vlgmr.msra.gmra.mrb[8].mxu0 %vm892_vm3, %v903_v48 }
 0x3dc   : > { %1825 = vmatpush3.bf16.xpose.msra.mxu0 %v1007_v50  ;;  %1826 = vmatprep.mubr.msk.bf16.mxu0 %vm2507_vm0, %v2506_v0 }
 0x3dd   : > { %1842 = vmatprep.subr.bf16.mxu0 %v2506_v0 }
 0x3e3   : > { %1827 = vmatmul.mubr.msk.bf16.vlgmr.msra.gmra.mrb[12].mxu0 %vm845_vm2, %v999_v49 }
 0x3e4   : > { %1843 = vmatpush3.bf16.xpose.msra.mxu0 %v1164_v52  ;;  %1844 = vmatprep.mubr.msk.bf16.mxu0 %vm2507_vm0, %v2506_v0 }
 0x3e5   : > { %1848 = vmatprep.subr.bf16.mxu0 %v2506_v0 }
 0x3eb   : > { %1845 = vmatmul.mubr.msk.bf16.vlgmr.msra.gmra.mrb[16].mxu0 %vm845_vm2, %v1157_v53 }
 0x3ec   : > { %1849 = vmatpush3.bf16.msra.mxu0 %v1218_v54  ;;  %1850 = vmatprep.mubr.msk.bf16.mxu0 %vm2507_vm0, %v2506_v0 }
 0x3ed   : > { %1860 = vmatprep.subr.bf16.mxu0 %v2506_v0 }
 0x467   : > { %v901_v59 = vpop.xlane.xlu0 %900 }
 0x468   : > { %2061 = vrcp.f32 %v901_v59 }
 0x472   : > { %v2062_v60 = vpop.eup %2061 }
 0x4ae   : > { %v941_v61 = vpop.f32.mrb[8].mxu0 }
 0x4af   : > { %v947_v62 = vmul.f32 %v2062_v60, %v941_v61  ;;  %v1816_v63 = vpop.f32.mrb[9].mxu0 }
 0x4b0   : > { %v944_v1 = vpop.f32.mrb[10].mxu0 }
 0x4b1   : > { %v948_v2 = vpack.c.bf16 %v947_v62, %v947_v62  ;;  %v1817_v3 = vpop.f32.mrb[11].mxu0 }
 0x4b3   : > { %1821 = vmatmul.mubr.msk.bf16.vlgmr.msra.gmra.mrb[8].mxu1 %vm845_vm2, %v948_v2 }
 0x4b4   : > { %1832 = vmatprep.mubr.msk.bf16.mxu1 %vm2507_vm0, %v2506_v0 }
 0x4b6   : > { %v1043_v4 = vpop.f32.mrb[12].mxu0 }
 0x4b7   : > { %v1828_v5 = vpop.f32.mrb[13].mxu0  ;;  %v1049_v13 = vsel %vm892_vm3, %v1043_v4, -inf }
 0x4b8   : > { %v1046_v6 = vpop.f32.mrb[14].mxu0 }
 0x4b9   : > { %v1829_v7 = vpop.f32.mrb[15].mxu0 }
 0x4ba   : > { %v1730_v7 = vld [vmem:[#allocation21] ss:$0 sm:$0xff] }
 0x4be   : > { %v1200_v8 = vpop.f32.mrb[16].mxu0 }
 0x4bf   : > { %v1846_v9 = vpop.f32.mrb[17].mxu0  ;;  %v1206_v10 = vsel %vm892_vm3, %v1200_v8, -inf }
 0x4c0   : > { %1207 = vmax.xlane.f32.xlu1 %v1206_v10  ;;  %v1203_v11 = vpop.f32.mrb[18].mxu0 }
 0x4c1   : > { %v1847_v12 = vpop.f32.mrb[19].mxu0 }
 0x4c4   : > { %1050 = vmax.xlane.f32.xlu1 %v1049_v13 }
 0x4d5   : > { %1061 = vrot.lane.b32.xlu1 %v3028_v36, %s2508_s28 }
 0x54d   : > { %v1208_v14 = vpop.xlane.xlu1 %1207 }
 0x54e   : > { %v1209_v15 = vsub.f32 %v1200_v8, %v1208_v14 }
 0x550   : > { %v1210_v16 = vmul.f32 1.442695, %v1209_v15 }
 0x551   : > { %v1051_v17 = vpop.xlane.xlu1 %1050 }
 0x552   : > { %2063 = vpow2.f32 %v1210_v16  ;;  %v1052_v18 = vsub.f32 %v1043_v4, %v1051_v17 }
 0x554   : > { %v1053_v19 = vmul.f32 1.442695, %v1052_v18 }
 0x555   : > { %v1062_v20 = vpop.permute.xlu1 %1061 }
 0x556   : > { %2065 = vpow2.f32 %v1053_v19  ;;  %1831 = vmatpush3.bf16.msra.mxu1 %v1062_v20 }
 0x557   : > { %1836 = vmatprep.subr.bf16.mxu1 %v2506_v0 }
 0x55c   : > { %v2064_v21 = vpop.eup %2063 }
 0x55d   : > { %v1212_v22 = vsel %vm892_vm3, %v2064_v21, 0.0  ;;  %v1216_v23 = vpack.c.bf16 %v2064_v21, %v2064_v21 }
 0x55e   : > { %1213 = vadd.xlane.f32.xlu1 %v1212_v22 }
 0x55f   : > { %1851 = vmatmul.mubr.msk.bf16.vlgmr.msra.gmra.mrb[20].mxu0 %vm892_vm3, %v1216_v23 }
 0x560   : > { %v2066_v25 = vpop.eup %2065  ;;  %1861 = vmatpush3.bf16.xpose.msra.mxu0 %v1320_v24  ;;  %1862 = vmatprep.mubr.msk.bf16.mxu0 %vm2507_vm0, %v2506_v0 }
 0x561   : > { %v1055_v26 = vsel %vm892_vm3, %v2066_v25, 0.0  ;;  %v1059_v27 = vpack.c.bf16 %v2066_v25, %v2066_v25 }
 0x562   : > { %1056 = vadd.xlane.f32.xlu0 %v1055_v26 }
 0x563   : > { %1833 = vmatmul.mubr.msk.bf16.vlgmr.msra.gmra.mrb[12].mxu1 %vm892_vm3, %v1059_v27 }
 0x564   : > { %1838 = vmatprep.mubr.msk.bf16.mxu1 %vm2507_vm0, %v2506_v0  ;;  %1837 = vmatpush3.bf16.msra.mxu1 %v1113_v29 }
 0x565   : > { %1854 = vmatprep.subr.bf16.mxu1 %v2506_v0 }
 0x567   : > { %1863 = vmatmul.mubr.msk.bf16.vlgmr.msra.gmra.mrb[24].mxu0 %vm845_vm2, %v1313_v58 }
 0x5eb   : > { %v1214_v32 = vpop.xlane.xlu1 %1213 }
 0x5ef   : > { %v1057_v30 = vpop.xlane.xlu0 %1056 }
 0x5f0   : > { %2067 = vrcp.f32 %v1057_v30 }
 0x5f1   : > { %2069 = vrcp.f32 %v1214_v32 }
 0x5fa   : > { %v2068_v37 = vpop.eup %2067 }
 0x5fb   : > { %v2070_v51 = vpop.eup %2069 }
 0x632   : > { %v1257_v31 = vpop.f32.mrb[20].mxu0 }
 0x633   : > { %v1852_v33 = vpop.f32.mrb[21].mxu0  ;;  %v1263_v52 = vmul.f32 %v2070_v51, %v1257_v31 }
 0x634   : > { %v1260_v34 = vpop.f32.mrb[22].mxu0 }
 0x635   : > { %v1853_v35 = vpop.f32.mrb[23].mxu0  ;;  %v1264_v53 = vpack.c.bf16 %v1263_v52, %v1263_v52 }
 0x636   : > { %v1101_v38 = vpop.f32.mrb[12].mxu1 }
 0x637   : > { %v1107_v40 = vmul.f32 %v2068_v37, %v1101_v38  ;;  %v1834_v41 = vpop.f32.mrb[13].mxu1 }
 0x638   : > { %v1104_v42 = vpop.f32.mrb[14].mxu1 }
 0x639   : > { %v1108_v43 = vpack.c.bf16 %v1107_v40, %v1107_v40  ;;  %v1835_v44 = vpop.f32.mrb[15].mxu1 }
 0x63a   : > { %v1356_v46 = vpop.f32.mrb[24].mxu0 }
 0x63b   : > { %1839 = vmatmul.mubr.msk.bf16.vlgmr.msra.gmra.mrb[8].mxu1 %vm845_vm2, %v1108_v43  ;;  %v1864_v47 = vpop.f32.mrb[25].mxu0  ;;  %v1362_v48 = vsel %vm892_vm3, %v1356_v46, -inf }
 0x63c   : > { %1363 = vmax.xlane.f32.xlu0 %v1362_v48  ;;  %v1359_v49 = vpop.f32.mrb[26].mxu0  ;;  %1855 = vmatpush3.bf16.msra.mxu1 %v1269_v45 }
 0x63d   : > { %v1865_v50 = vpop.f32.mrb[27].mxu0  ;;  %1856 = vmatprep.mubr.msk.bf16.mxu1 %vm2507_vm0, %v2506_v0  ;;  %1866 = vmatprep.subr.bf16.mxu1 %v2506_v0 }
 0x647   : > { %1857 = vmatmul.mubr.msk.bf16.vlgmr.msra.gmra.mrb[8].mxu1 %vm845_vm2, %v1264_v53 }
 0x648   : > { %1868 = vmatprep.mubr.msk.bf16.mxu1 %vm2507_vm0, %v2506_v0 }
 0x652   : > { %1373 = vrot.lane.b32.xlu0 %v3028_v36, %s2510_s3  ;;  %v837_v36 = vld [vmem:[#allocation19 + $0xc] sm:$0xf] }
 0x653   : > { %v1425_v61 = vsel %vm952_vm4, %v837_v36, 0 }
 0x6c9   : > { %v1364_v54 = vpop.xlane.xlu0 %1363 }
 0x6ca   : > { %v1365_v55 = vsub.f32 %v1356_v46, %v1364_v54 }
 0x6cc   : > { %v1366_v56 = vmul.f32 1.442695, %v1365_v55 }
 0x6cd   : > { %v1374_v57 = vpop.permute.xlu0 %1373 }
 0x6ce   : > { %2071 = vpow2.f32 %v1366_v56  ;;  %1867 = vmatpush3.bf16.msra.mxu1 %v1374_v57 }
 0x6cf   : > { %1872 = vmatprep.subr.bf16.mxu1 %v2506_v0 }
 0x6d8   : > { %v2072_v58 = vpop.eup %2071 }
 0x6d9   : > { %v1368_v59 = vsel %vm892_vm3, %v2072_v58, 0.0  ;;  %v1372_v60 = vpack.c.bf16 %v2072_v58, %v2072_v58 }
 0x6da   : > { %1369 = vadd.xlane.f32.xlu0 %v1368_v59 }
 0x6db   : > { %1869 = vmatmul.mubr.msk.bf16.vlgmr.msra.gmra.mrb[16].mxu1 %vm892_vm3, %v1372_v60 }
 0x6dc   : > { %1874 = vmatprep.mubr.msk.bf16.mxu1 %vm2507_vm0, %v2506_v0  ;;  %1873 = vmatpush3.bf16.msra.mxu1 %v1425_v61 }
 0x767   : > { %v1370_v62 = vpop.xlane.xlu0 %1369 }
 0x768   : > { %2073 = vrcp.f32 %v1370_v62 }
 0x772   : > { %v2074_v63 = vpop.eup %2073 }
 0x7ae   : > { %v1413_v1 = vpop.f32.mrb[16].mxu1 }
 0x7af   : > { %v1419_v2 = vmul.f32 %v2074_v63, %v1413_v1  ;;  %v1870_v3 = vpop.f32.mrb[17].mxu1 }
 0x7b0   : > { %v1416_v4 = vpop.f32.mrb[18].mxu1 }
 0x7b1   : > { %v1420_v5 = vpack.c.bf16 %v1419_v2, %v1419_v2  ;;  %v1871_v6 = vpop.f32.mrb[19].mxu1 }
 0x7b3   : > { %1875 = vmatmul.mubr.msk.bf16.vlgmr.msra.gmra.mrb[8].mxu1 %vm845_vm2, %v1420_v5 }
 0x886   : > { %v1461_v0 = vpop.f32.mrb[8].mxu1 }
 0x887   : > { %v1878_v8 = vadd.f32 %v1730_v7, %v1461_v0  ;;  %v1876_v9 = vpop.f32.mrb[9].mxu1 }
 0x888   : > { %v1464_v10 = vpop.f32.mrb[10].mxu1 }
 0x889   : > { %v1877_v11 = vpop.f32.mrb[11].mxu1  ;;  %1468 = vst.msk [vmem:[%s603_s30] sm:$0xff] %vm641_vm1, %v1878_v8 }
 0x88a   : > { %2402 = shalt.err (!%p2399_p3)
}
 0x88b   : > { %s2403_s14 = scalar_lea.hbm %s3097_s10, 128  ;;  %s2407_s7 = scalar_lea.hbm %s3248_s26, 256 }
 0x88c   : > { %p2404_p13 = scmp.ne.s32.totalorder %s3097_s10, %s2403_s14  ;;  %p2408_p8 = scmp.lt.u32.totalorder %s3097_s10, %s3248_s26 }
 0x88d   : > { %p2409_p12 = scmp.lt.u32.totalorder %s2407_s7, %s2403_s14  ;;  %p2411_p7 = scmp.lt.u32.totalorder %s2403_s14, %s3097_s10 }
 0x88e   : > { %p2405_p2 = pnand %p2404_p13, %p3249_p11 }
 0x88f   : > { %p2410_p9 = por %p2409_p12, %p2408_p8 }
 0x890   : > { %p2406_p4 = pneg %p2405_p2 }
 0x891   : > { %p2412_p5 = por %p2411_p7, %p2410_p9 }
 0x893   : > { %p2413_p1 = pnand %p2412_p5, %p2406_p4 }
 0x895   : > { %2416 = shalt.err (!%p2413_p1)
}
 0x896   : > { %1929 = dma.vmem_to_hbm [thread:$0]  (%p3249_p11), %s3099_s23, 128, %s3097_s10, %s1470_s9  }
 0x897 PF: > { %s3250_s28 = sld [smem:[#allocation30_spill]]  ;;  %s3251_s25 = sld [smem:[#allocation39_spill]] }
 0x898   : > { %s3252_s3 = sld [smem:[#allocation33_spill]] }
 0x89d   : > { %s1496_s27 = sand.u32 1, %s3250_s28   ;;  %p3253_p6 = scmp.ne.s32.totalorder %s3251_s25, 0 }
 0x89e   : > { %p3254_p0 = scmp.ge.s32.totalorder %s3252_s3, 2  ;;  %s1497_s16 = scalar_lea.sflag [#allocation6], %s1496_s27 }
 0x8a0   : > { %p1967_p10 = pnand %p3254_p0, %p3253_p6 }
 0x8a2   : > { %2466 = dma.done.wait (!%p1967_p10), %s1497_s16, 128  }
 0x8a3   : > { %2468 = vsyncadd (!%p1967_p10), %s1497_s16, 4294967168  ;;  %s34_s22 = sadd.s32 1, %s3252_s3   ;;  %s3255_s30 = sld [smem:[#allocation31_spill]] }
 0x8a4   : > { %p31_p3 = scmp.ge.s32.totalorder %s34_s22, 4   ;;  %s3256_s19 = sld [smem:[#allocation38_spill]] }
 0x8a5   : > { %s3257_s12 = sld [smem:[#allocation36_spill]]  ;;  %s3258_s17 = smov %s2475_s18 }
 0x8a6   : > { %s3260_s20 = smov %s2487_s21  ;;  %33 = sbr.rel (!%p31_p3) target bundleno = 21 (0x15), region = 169 }
 0x8a9   : > { %s3259_s18 = smov %s3255_s30 }
 0x8ab   : > { %s3261_s21 = smov %s3257_s12 }
 0x8ad   :  { %1502 = vsyncpa [#allocation5], 1 }
 0x8ae   :  { %1504 = vsyncpa [#allocation5 + $0x1], 1 }
 0x8af   :  { %1505 = vsyncpa [#allocation8], 1 }
 0x8b0   :  { %1507 = vsyncpa [#allocation8 + $0x1], 1 }
 0x8b1   :  { %1508 = vsyncpa [#allocation11], 1 }
 0x8b2   :  { %1509 = vsyncpa [#allocation14], 1 }
 0x8b3   :  { %1510 = vsyncpa [#allocation17], 1 }
 0x8b4   :  { %1511 = vsyncpa [#allocation20], 1 }
 0x8b5   :  { %1512 = vsyncpa [#allocation6], 1 }
 0x8b6   :  { %1514 = vsyncpa [#allocation6 + $0x1], 1 }

</bundles_post_ra>
